<compile_context>
chip_gen: v6e
topology: v6e:2x2x1
jax: 0.10.0
libtpu: 0.0.40
codegen_flags: <defaults>
</compile_context>

<pallas_src>
import functools

import jax
import jax.numpy as jnp
from jax.experimental import pallas as pl
from jax.experimental.pallas import tpu as pltpu


def _shift_crop_kernel(shift_ref, x_ref, out_ref, rbuf, *, bn, c, h, w, pad):
    """One grid step == `bn` samples.

    shift_ref: (2, n_pad) int32 in SMEM (scalar prefetch); row 0 = sx, row 1 = sy.
    x_ref:     (bn, c, h, w) input block  (pipelined VMEM).
    out_ref:   (bn, c, h, w) output block (pipelined VMEM).
    rbuf:      (c, h + 2*pad, w) VMEM scratch, reused per sample.
    """
    g = pl.program_id(0)
    H = h + 2 * pad

    for b in range(bn):  # bn is small & static -> unrolled
        idx = g * bn + b
        sx = shift_ref[0, idx]  # x-shift (width / lanes),  in [0, 2*pad]
        sy = shift_ref[1, idx]  # y-shift (height / sublanes), in [0, 2*pad]

        # --- rows: build replicate-padded rows, rbuf[r] = x[clamp(r - pad)] ---
        if pad > 0:
            rbuf[:, 0:pad, :] = jnp.broadcast_to(
                x_ref[b, :, 0:1, :], (c, pad, w))
            rbuf[:, pad + h:H, :] = jnp.broadcast_to(
                x_ref[b, :, h - 1:h, :], (c, pad, w))
        rbuf[:, pad:pad + h, :] = x_ref[b]

        # --- cols: dx = sx - pad takes only 2*pad+1 values -> branch-unroll ---
        for s in range(-pad, pad + 1):

            @pl.when(sx == s + pad)
            def _(s=s, sy=sy, b=b):
                # row-clamped crop: one dynamic-sublane-start load
                rows = rbuf[:, pl.ds(sy, h), :]          # (c, h, w)
                if s == 0:
                    out_ref[b] = rows
                elif s > 0:
                    out_ref[b, :, :, 0:w - s] = rows[:, :, s:w]
                    out_ref[b, :, :, w - s:w] = jnp.broadcast_to(
                        rows[:, :, w - 1:w], (c, h, s))
                else:
                    k = -s
                    out_ref[b, :, :, 0:k] = jnp.broadcast_to(
                        rows[:, :, 0:1], (c, h, k))
                    out_ref[b, :, :, k:w] = rows[:, :, 0:w - k]


def _pick_sample_block(n, c, h, w, pad, itemsize,
                       max_bn=16, budget_bytes=24 << 20):
    """Largest samples-per-step whose double-buffered, (8,128)-padded in/out
    blocks (+ scratch) fit a conservative VMEM budget, while keeping >= 2 grid
    steps when n > 1 so both v7x TensorCores get work."""
    sub = max(8, 32 // itemsize)                  # sublane tile for this dtype
    h_t = pl.cdiv(h, sub) * sub
    w_t = pl.cdiv(w, 128) * 128
    per_sample = c * h_t * w_t * itemsize         # padded VMEM bytes / sample
    rbuf_bytes = c * (pl.cdiv(h + 2 * pad, sub) * sub) * w_t * itemsize
    bn = 1
    for cand in range(1, max_bn + 1):
        if 2 * (2 * cand * per_sample) + rbuf_bytes <= budget_bytes:
            bn = cand
    bn = min(bn, n, max(1, pl.cdiv(n, 2)))
    return bn


@functools.partial(jax.jit, static_argnames=("pad",))
def random_shifts_aug(x, shift, *, pad):
    """Pallas equivalent of RandomShiftsAug.forward.

    x:     (n, c, h, w) array (NCHW), h == w.  Crop runs in x.dtype; result is
           cast to float32 to match the module's `x.float()`.
    shift: (n, 2) int32 in [0, 2*pad]; column 0 = x-shift, column 1 = y-shift
           (same convention as torch.randint(0, 2*pad+1, size=(n, 1, 1, 2))).
           The torch module draws these internally; here they are an explicit
           input so the kernel stays deterministic and testable.
    """
    n, c, h, w = x.shape
    assert h == w
    itemsize = jnp.dtype(x.dtype).itemsize

    # Validate/clamp shifts: out-of-range values would make the dynamic VMEM
    # slice OOB (no runtime bounds check on VMEM refs).
    shift = jnp.clip(shift.astype(jnp.int32), 0, 2 * pad)

    bn = _pick_sample_block(n, c, h, w, pad, itemsize)
    num_blocks = pl.cdiv(n, bn)
    n_pad = num_blocks * bn

    # (n,2) -> (2, n_pad): keep the long axis last for SMEM, pad the tail with
    # zeros so scalar reads for out-of-range tail samples stay in-bounds.
    shift_t = jnp.zeros((2, n_pad), jnp.int32).at[:, :n].set(shift.T)

    kernel = functools.partial(_shift_crop_kernel,
                               bn=bn, c=c, h=h, w=w, pad=pad)

    out = pl.pallas_call(
        kernel,
        out_shape=jax.ShapeDtypeStruct((n, c, h, w), x.dtype),
        grid_spec=pltpu.PrefetchScalarGridSpec(
            num_scalar_prefetch=1,
            grid=(num_blocks,),
            in_specs=[
                pl.BlockSpec((bn, c, h, w), lambda i, s: (i, 0, 0, 0)),
            ],
            out_specs=pl.BlockSpec((bn, c, h, w), lambda i, s: (i, 0, 0, 0)),
            scratch_shapes=[pltpu.VMEM((c, h + 2 * pad, w), x.dtype)],
        ),
        compiler_params=pltpu.CompilerParams(
            dimension_semantics=("parallel",),
            vmem_limit_bytes=48 * 1024 * 1024,
        ),
        cost_estimate=pl.CostEstimate(
            flops=0,
            transcendentals=0,
            bytes_accessed=2 * n * c * h * w * itemsize,  # read x + write out
        ),
    )(shift_t, x)

    # Module semantics: x = x.float() -> output is float32 (no-op if already).
    return out.astype(jnp.float32)


def _reference(x, shift, pad):
    """Pure-JAX reference: integer shifts make grid_sample an exact crop of
    the replicate-padded image."""
    x = x.astype(jnp.float32)
    n, c, h, w = x.shape
    xpad = jnp.pad(x, ((0, 0), (0, 0), (pad, pad), (pad, pad)), mode="edge")
    outs = []
    for i in range(n):
        sx = int(shift[i, 0])
        sy = int(shift[i, 1])
        outs.append(xpad[i, :, sy:sy + h, sx:sx + w])
    return jnp.stack(outs, axis=0)


if __name__ == "__main__":
    key = jax.random.PRNGKey(0)
    k_x, k_s = jax.random.split(key)

    pad = 4
    n, c, h, w = 2, 4, 16, 16
    x = jax.random.normal(k_x, (n, c, h, w), dtype=jnp.float32)
    # shift ~ randint(0, 2*pad+1), one (x, y) pair per sample
    shift = jax.random.randint(k_s, (n, 2), 0, 2 * pad + 1, dtype=jnp.int32)

    out = random_shifts_aug(x, shift, pad=pad)
    out = jax.block_until_ready(out)

    ref = _reference(x, shift, pad)
    assert out.shape == (n, c, h, w)
    assert out.dtype == jnp.float32
    assert jnp.max(jnp.abs(out - ref)) < 1e-6, "mismatch vs reference crop"

    print("KERNEL_OK")
</pallas_src>

<mosaic_0001>
module attributes {stable_mosaic.version = 11 : i64} {
  func.func @_shift_crop_kernel(%arg0: i32, %arg1: memref<2x2xi32, #tpu.memory_space<smem>>, %arg2: memref<1x4x16x16xf32, #tpu.memory_space<vmem>>, %arg3: memref<1x4x16x16xf32, #tpu.memory_space<vmem>>, %arg4: memref<4x24x16xf32, #tpu.memory_space<vmem>>) attributes {dimension_semantics = [#tpu.dimension_semantics<parallel>], iteration_bounds = array<i64: 2>, scalar_prefetch = 1 : i64, scratch_operands = 1 : i64, tpu.core_type = #tpu.core_type<tc>, window_params = [{transform_indices = @transform_0, window_bounds = array<i64: 1, 4, 16, 16>}, {transform_indices = @transform_1, window_bounds = array<i64: 1, 4, 16, 16>}]} {
    %c1_i32 = arith.constant 1 : i32
    %0 = arith.muli %arg0, %c1_i32 : i32
    %c0_i32 = arith.constant 0 : i32
    %1 = arith.addi %0, %c0_i32 : i32
    %c0 = arith.constant 0 : index
    %2 = arith.index_cast %1 : i32 to index
    %3 = memref.load %arg1[%c0, %2] : memref<2x2xi32, #tpu.memory_space<smem>>
    %c1 = arith.constant 1 : index
    %4 = arith.index_cast %1 : i32 to index
    %5 = memref.load %arg1[%c1, %4] : memref<2x2xi32, #tpu.memory_space<smem>>
    %c0_0 = arith.constant 0 : index
    %c0_1 = arith.constant 0 : index
    %c0_2 = arith.constant 0 : index
    %c0_3 = arith.constant 0 : index
    %6 = vector.load %arg2[%c0_0, %c0_1, %c0_2, %c0_3] : memref<1x4x16x16xf32, #tpu.memory_space<vmem>>, vector<1x4x1x16xf32>
    %7 = vector.shape_cast %6 : vector<1x4x1x16xf32> to vector<4x1x16xf32>
    %8 = vector.shape_cast %7 : vector<4x1x16xf32> to vector<4x1x16xf32>
    %9 = vector.broadcast %8 : vector<4x1x16xf32> to vector<4x4x16xf32>
    %c0_4 = arith.constant 0 : index
    %c0_5 = arith.constant 0 : index
    %c0_6 = arith.constant 0 : index
    %10 = vector.load %arg4[%c0_4, %c0_5, %c0_6] : memref<4x24x16xf32, #tpu.memory_space<vmem>>, vector<4x4x16xf32>
    tpu.vector_store %arg4[%c0_4, %c0_5, %c0_6], %9 {strides = array<i32>} : memref<4x24x16xf32, #tpu.memory_space<vmem>>, vector<4x4x16xf32>,
    %c0_7 = arith.constant 0 : index
    %c0_8 = arith.constant 0 : index
    %c15 = arith.constant 15 : index
    %c0_9 = arith.constant 0 : index
    %11 = vector.load %arg2[%c0_7, %c0_8, %c15, %c0_9] : memref<1x4x16x16xf32, #tpu.memory_space<vmem>>, vector<1x4x1x16xf32>
    %12 = vector.shape_cast %11 : vector<1x4x1x16xf32> to vector<4x1x16xf32>
    %13 = vector.shape_cast %12 : vector<4x1x16xf32> to vector<4x1x16xf32>
    %14 = vector.broadcast %13 : vector<4x1x16xf32> to vector<4x4x16xf32>
    %c0_10 = arith.constant 0 : index
    %c20 = arith.constant 20 : index
    %c0_11 = arith.constant 0 : index
    %15 = vector.load %arg4[%c0_10, %c20, %c0_11] : memref<4x24x16xf32, #tpu.memory_space<vmem>>, vector<4x4x16xf32>
    tpu.vector_store %arg4[%c0_10, %c20, %c0_11], %14 {strides = array<i32>} : memref<4x24x16xf32, #tpu.memory_space<vmem>>, vector<4x4x16xf32>,
    %c0_12 = arith.constant 0 : index
    %c0_13 = arith.constant 0 : index
    %c0_14 = arith.constant 0 : index
    %c0_15 = arith.constant 0 : index
    %16 = vector.load %arg2[%c0_12, %c0_13, %c0_14, %c0_15] : memref<1x4x16x16xf32, #tpu.memory_space<vmem>>, vector<1x4x16x16xf32>
    %17 = vector.shape_cast %16 : vector<1x4x16x16xf32> to vector<4x16x16xf32>
    %c0_16 = arith.constant 0 : index
    %c4 = arith.constant 4 : index
    %c0_17 = arith.constant 0 : index
    %18 = vector.load %arg4[%c0_16, %c4, %c0_17] : memref<4x24x16xf32, #tpu.memory_space<vmem>>, vector<4x16x16xf32>
    tpu.vector_store %arg4[%c0_16, %c4, %c0_17], %17 {strides = array<i32>} : memref<4x24x16xf32, #tpu.memory_space<vmem>>, vector<4x16x16xf32>,
    %c0_i32_18 = arith.constant 0 : i32
    %19 = arith.cmpi eq, %3, %c0_i32_18 : i32
    %20 = arith.extui %19 : i1 to i32
    %c0_i32_19 = arith.constant 0 : i32
    %21 = arith.cmpi ne, %20, %c0_i32_19 : i32
    scf.if %21 {
      %c0_29 = arith.constant 0 : index
      %46 = arith.index_cast %5 : i32 to index
      %c0_30 = arith.constant 0 : index
      %47 = vector.load %arg4[%c0_29, %46, %c0_30] : memref<4x24x16xf32, #tpu.memory_space<vmem>>, vector<4x16x16xf32>
      %48 = vector.extract_strided_slice %47 {offsets = [0, 0, 0], sizes = [4, 16, 1], strides = [1, 1, 1]} : vector<4x16x16xf32> to vector<4x16x1xf32>
      %49 = vector.shape_cast %48 : vector<4x16x1xf32> to vector<4x16x1xf32>
      %50 = vector.broadcast %49 : vector<4x16x1xf32> to vector<4x16x4xf32>
      %c0_31 = arith.constant 0 : index
      %c0_32 = arith.constant 0 : index
      %c0_33 = arith.constant 0 : index
      %c0_34 = arith.constant 0 : index
      %51 = vector.load %arg3[%c0_31, %c0_32, %c0_33, %c0_34] : memref<1x4x16x16xf32, #tpu.memory_space<vmem>>, vector<1x4x16x4xf32>
      %52 = vector.shape_cast %51 : vector<1x4x16x4xf32> to vector<4x16x4xf32>
      %53 = vector.shape_cast %50 : vector<4x16x4xf32> to vector<1x4x16x4xf32>
      tpu.vector_store %arg3[%c0_31, %c0_32, %c0_33, %c0_34], %53 {strides = array<i32>} : memref<1x4x16x16xf32, #tpu.memory_space<vmem>>, vector<1x4x16x4xf32>,
      %54 = vector.extract_strided_slice %47 {offsets = [0, 0, 0], sizes = [4, 16, 12], strides = [1, 1, 1]} : vector<4x16x16xf32> to vector<4x16x12xf32>
      %c0_35 = arith.constant 0 : index
      %c0_36 = arith.constant 0 : index
      %c0_37 = arith.constant 0 : index
      %c4_38 = arith.constant 4 : index
      %55 = vector.load %arg3[%c0_35, %c0_36, %c0_37, %c4_38] : memref<1x4x16x16xf32, #tpu.memory_space<vmem>>, vector<1x4x16x12xf32>
      %56 = vector.shape_cast %55 : vector<1x4x16x12xf32> to vector<4x16x12xf32>
      %57 = vector.shape_cast %54 : vector<4x16x12xf32> to vector<1x4x16x12xf32>
      tpu.vector_store %arg3[%c0_35, %c0_36, %c0_37, %c4_38], %57 {strides = array<i32>} : memref<1x4x16x16xf32, #tpu.memory_space<vmem>>, vector<1x4x16x12xf32>,
    } else {
    }
    %c1_i32_20 = arith.constant 1 : i32
    %22 = arith.cmpi eq, %3, %c1_i32_20 : i32
    %23 = arith.extui %22 : i1 to i32
    %c0_i32_21 = arith.constant 0 : i32
    %24 = arith.cmpi ne, %23, %c0_i32_21 : i32
    scf.if %24 {
      %c0_29 = arith.constant 0 : index
      %46 = arith.index_cast %5 : i32 to index
      %c0_30 = arith.constant 0 : index
      %47 = vector.load %arg4[%c0_29, %46, %c0_30] : memref<4x24x16xf32, #tpu.memory_space<vmem>>, vector<4x16x16xf32>
      %48 = vector.extract_strided_slice %47 {offsets = [0, 0, 0], sizes = [4, 16, 1], strides = [1, 1, 1]} : vector<4x16x16xf32> to vector<4x16x1xf32>
      %49 = vector.shape_cast %48 : vector<4x16x1xf32> to vector<4x16x1xf32>
      %50 = vector.broadcast %49 : vector<4x16x1xf32> to vector<4x16x3xf32>
      %c0_31 = arith.constant 0 : index
      %c0_32 = arith.constant 0 : index
      %c0_33 = arith.constant 0 : index
      %c0_34 = arith.constant 0 : index
      %51 = vector.load %arg3[%c0_31, %c0_32, %c0_33, %c0_34] : memref<1x4x16x16xf32, #tpu.memory_space<vmem>>, vector<1x4x16x3xf32>
      %52 = vector.shape_cast %51 : vector<1x4x16x3xf32> to vector<4x16x3xf32>
      %53 = vector.shape_cast %50 : vector<4x16x3xf32> to vector<1x4x16x3xf32>
      tpu.vector_store %arg3[%c0_31, %c0_32, %c0_33, %c0_34], %53 {strides = array<i32>} : memref<1x4x16x16xf32, #tpu.memory_space<vmem>>, vector<1x4x16x3xf32>,
      %54 = vector.extract_strided_slice %47 {offsets = [0, 0, 0], sizes = [4, 16, 13], strides = [1, 1, 1]} : vector<4x16x16xf32> to vector<4x16x13xf32>
      %c0_35 = arith.constant 0 : index
      %c0_36 = arith.constant 0 : index
      %c0_37 = arith.constant 0 : index
      %c3 = arith.constant 3 : index
      %55 = vector.load %arg3[%c0_35, %c0_36, %c0_37, %c3] : memref<1x4x16x16xf32, #tpu.memory_space<vmem>>, vector<1x4x16x13xf32>
      %56 = vector.shape_cast %55 : vector<1x4x16x13xf32> to vector<4x16x13xf32>
      %57 = vector.shape_cast %54 : vector<4x16x13xf32> to vector<1x4x16x13xf32>
      tpu.vector_store %arg3[%c0_35, %c0_36, %c0_37, %c3], %57 {strides = array<i32>} : memref<1x4x16x16xf32, #tpu.memory_space<vmem>>, vector<1x4x16x13xf32>,
    } else {
    }
    %c2_i32 = arith.constant 2 : i32
    %25 = arith.cmpi eq, %3, %c2_i32 : i32
    %26 = arith.extui %25 : i1 to i32
    %c0_i32_22 = arith.constant 0 : i32
    %27 = arith.cmpi ne, %26, %c0_i32_22 : i32
    scf.if %27 {
      %c0_29 = arith.constant 0 : index
      %46 = arith.index_cast %5 : i32 to index
      %c0_30 = arith.constant 0 : index
      %47 = vector.load %arg4[%c0_29, %46, %c0_30] : memref<4x24x16xf32, #tpu.memory_space<vmem>>, vector<4x16x16xf32>
      %48 = vector.extract_strided_slice %47 {offsets = [0, 0, 0], sizes = [4, 16, 1], strides = [1, 1, 1]} : vector<4x16x16xf32> to vector<4x16x1xf32>
      %49 = vector.shape_cast %48 : vector<4x16x1xf32> to vector<4x16x1xf32>
      %50 = vector.broadcast %49 : vector<4x16x1xf32> to vector<4x16x2xf32>
      %c0_31 = arith.constant 0 : index
      %c0_32 = arith.constant 0 : index
      %c0_33 = arith.constant 0 : index
      %c0_34 = arith.constant 0 : index
      %51 = vector.load %arg3[%c0_31, %c0_32, %c0_33, %c0_34] : memref<1x4x16x16xf32, #tpu.memory_space<vmem>>, vector<1x4x16x2xf32>
      %52 = vector.shape_cast %51 : vector<1x4x16x2xf32> to vector<4x16x2xf32>
      %53 = vector.shape_cast %50 : vector<4x16x2xf32> to vector<1x4x16x2xf32>
      tpu.vector_store %arg3[%c0_31, %c0_32, %c0_33, %c0_34], %53 {strides = array<i32>} : memref<1x4x16x16xf32, #tpu.memory_space<vmem>>, vector<1x4x16x2xf32>,
      %54 = vector.extract_strided_slice %47 {offsets = [0, 0, 0], sizes = [4, 16, 14], strides = [1, 1, 1]} : vector<4x16x16xf32> to vector<4x16x14xf32>
      %c0_35 = arith.constant 0 : index
      %c0_36 = arith.constant 0 : index
      %c0_37 = arith.constant 0 : index
      %c2 = arith.constant 2 : index
      %55 = vector.load %arg3[%c0_35, %c0_36, %c0_37, %c2] : memref<1x4x16x16xf32, #tpu.memory_space<vmem>>, vector<1x4x16x14xf32>
      %56 = vector.shape_cast %55 : vector<1x4x16x14xf32> to vector<4x16x14xf32>
      %57 = vector.shape_cast %54 : vector<4x16x14xf32> to vector<1x4x16x14xf32>
      tpu.vector_store %arg3[%c0_35, %c0_36, %c0_37, %c2], %57 {strides = array<i32>} : memref<1x4x16x16xf32, #tpu.memory_space<vmem>>, vector<1x4x16x14xf32>,
    } else {
    }
    %c3_i32 = arith.constant 3 : i32
    %28 = arith.cmpi eq, %3, %c3_i32 : i32
    %29 = arith.extui %28 : i1 to i32
    %c0_i32_23 = arith.constant 0 : i32
    %30 = arith.cmpi ne, %29, %c0_i32_23 : i32
    scf.if %30 {
      %c0_29 = arith.constant 0 : index
      %46 = arith.index_cast %5 : i32 to index
      %c0_30 = arith.constant 0 : index
      %47 = vector.load %arg4[%c0_29, %46, %c0_30] : memref<4x24x16xf32, #tpu.memory_space<vmem>>, vector<4x16x16xf32>
      %48 = vector.extract_strided_slice %47 {offsets = [0, 0, 0], sizes = [4, 16, 1], strides = [1, 1, 1]} : vector<4x16x16xf32> to vector<4x16x1xf32>
      %c0_31 = arith.constant 0 : index
      %c0_32 = arith.constant 0 : index
      %c0_33 = arith.constant 0 : index
      %c0_34 = arith.constant 0 : index
      %49 = vector.load %arg3[%c0_31, %c0_32, %c0_33, %c0_34] : memref<1x4x16x16xf32, #tpu.memory_space<vmem>>, vector<1x4x16x1xf32>
      %50 = vector.shape_cast %49 : vector<1x4x16x1xf32> to vector<4x16x1xf32>
      %51 = vector.shape_cast %48 : vector<4x16x1xf32> to vector<1x4x16x1xf32>
      tpu.vector_store %arg3[%c0_31, %c0_32, %c0_33, %c0_34], %51 {strides = array<i32>} : memref<1x4x16x16xf32, #tpu.memory_space<vmem>>, vector<1x4x16x1xf32>,
      %52 = vector.extract_strided_slice %47 {offsets = [0, 0, 0], sizes = [4, 16, 15], strides = [1, 1, 1]} : vector<4x16x16xf32> to vector<4x16x15xf32>
      %c0_35 = arith.constant 0 : index
      %c0_36 = arith.constant 0 : index
      %c0_37 = arith.constant 0 : index
      %c1_38 = arith.constant 1 : index
      %53 = vector.load %arg3[%c0_35, %c0_36, %c0_37, %c1_38] : memref<1x4x16x16xf32, #tpu.memory_space<vmem>>, vector<1x4x16x15xf32>
      %54 = vector.shape_cast %53 : vector<1x4x16x15xf32> to vector<4x16x15xf32>
      %55 = vector.shape_cast %52 : vector<4x16x15xf32> to vector<1x4x16x15xf32>
      tpu.vector_store %arg3[%c0_35, %c0_36, %c0_37, %c1_38], %55 {strides = array<i32>} : memref<1x4x16x16xf32, #tpu.memory_space<vmem>>, vector<1x4x16x15xf32>,
    } else {
    }
    %c4_i32 = arith.constant 4 : i32
    %31 = arith.cmpi eq, %3, %c4_i32 : i32
    %32 = arith.extui %31 : i1 to i32
    %c0_i32_24 = arith.constant 0 : i32
    %33 = arith.cmpi ne, %32, %c0_i32_24 : i32
    scf.if %33 {
      %c0_29 = arith.constant 0 : index
      %46 = arith.index_cast %5 : i32 to index
      %c0_30 = arith.constant 0 : index
      %47 = vector.load %arg4[%c0_29, %46, %c0_30] : memref<4x24x16xf32, #tpu.memory_space<vmem>>, vector<4x16x16xf32>
      %c0_31 = arith.constant 0 : index
      %c0_32 = arith.constant 0 : index
      %c0_33 = arith.constant 0 : index
      %c0_34 = arith.constant 0 : index
      %48 = vector.load %arg3[%c0_31, %c0_32, %c0_33, %c0_34] : memref<1x4x16x16xf32, #tpu.memory_space<vmem>>, vector<1x4x16x16xf32>
      %49 = vector.shape_cast %48 : vector<1x4x16x16xf32> to vector<4x16x16xf32>
      %50 = vector.shape_cast %47 : vector<4x16x16xf32> to vector<1x4x16x16xf32>
      tpu.vector_store %arg3[%c0_31, %c0_32, %c0_33, %c0_34], %50 {strides = array<i32>} : memref<1x4x16x16xf32, #tpu.memory_space<vmem>>, vector<1x4x16x16xf32>,
    } else {
    }
    %c5_i32 = arith.constant 5 : i32
    %34 = arith.cmpi eq, %3, %c5_i32 : i32
    %35 = arith.extui %34 : i1 to i32
    %c0_i32_25 = arith.constant 0 : i32
    %36 = arith.cmpi ne, %35, %c0_i32_25 : i32
    scf.if %36 {
      %c0_29 = arith.constant 0 : index
      %46 = arith.index_cast %5 : i32 to index
      %c0_30 = arith.constant 0 : index
      %47 = vector.load %arg4[%c0_29, %46, %c0_30] : memref<4x24x16xf32, #tpu.memory_space<vmem>>, vector<4x16x16xf32>
      %48 = vector.extract_strided_slice %47 {offsets = [0, 0, 1], sizes = [4, 16, 15], strides = [1, 1, 1]} : vector<4x16x16xf32> to vector<4x16x15xf32>
      %c0_31 = arith.constant 0 : index
      %c0_32 = arith.constant 0 : index
      %c0_33 = arith.constant 0 : index
      %c0_34 = arith.constant 0 : index
      %49 = vector.load %arg3[%c0_31, %c0_32, %c0_33, %c0_34] : memref<1x4x16x16xf32, #tpu.memory_space<vmem>>, vector<1x4x16x15xf32>
      %50 = vector.shape_cast %49 : vector<1x4x16x15xf32> to vector<4x16x15xf32>
      %51 = vector.shape_cast %48 : vector<4x16x15xf32> to vector<1x4x16x15xf32>
      tpu.vector_store %arg3[%c0_31, %c0_32, %c0_33, %c0_34], %51 {strides = array<i32>} : memref<1x4x16x16xf32, #tpu.memory_space<vmem>>, vector<1x4x16x15xf32>,
      %52 = vector.extract_strided_slice %47 {offsets = [0, 0, 15], sizes = [4, 16, 1], strides = [1, 1, 1]} : vector<4x16x16xf32> to vector<4x16x1xf32>
      %c0_35 = arith.constant 0 : index
      %c0_36 = arith.constant 0 : index
      %c0_37 = arith.constant 0 : index
      %c15_38 = arith.constant 15 : index
      %53 = vector.load %arg3[%c0_35, %c0_36, %c0_37, %c15_38] : memref<1x4x16x16xf32, #tpu.memory_space<vmem>>, vector<1x4x16x1xf32>
      %54 = vector.shape_cast %53 : vector<1x4x16x1xf32> to vector<4x16x1xf32>
      %55 = vector.shape_cast %52 : vector<4x16x1xf32> to vector<1x4x16x1xf32>
      tpu.vector_store %arg3[%c0_35, %c0_36, %c0_37, %c15_38], %55 {strides = array<i32>} : memref<1x4x16x16xf32, #tpu.memory_space<vmem>>, vector<1x4x16x1xf32>,
    } else {
    }
    %c6_i32 = arith.constant 6 : i32
    %37 = arith.cmpi eq, %3, %c6_i32 : i32
    %38 = arith.extui %37 : i1 to i32
    %c0_i32_26 = arith.constant 0 : i32
    %39 = arith.cmpi ne, %38, %c0_i32_26 : i32
    scf.if %39 {
      %c0_29 = arith.constant 0 : index
      %46 = arith.index_cast %5 : i32 to index
      %c0_30 = arith.constant 0 : index
      %47 = vector.load %arg4[%c0_29, %46, %c0_30] : memref<4x24x16xf32, #tpu.memory_space<vmem>>, vector<4x16x16xf32>
      %48 = vector.extract_strided_slice %47 {offsets = [0, 0, 2], sizes = [4, 16, 14], strides = [1, 1, 1]} : vector<4x16x16xf32> to vector<4x16x14xf32>
      %c0_31 = arith.constant 0 : index
      %c0_32 = arith.constant 0 : index
      %c0_33 = arith.constant 0 : index
      %c0_34 = arith.constant 0 : index
      %49 = vector.load %arg3[%c0_31, %c0_32, %c0_33, %c0_34] : memref<1x4x16x16xf32, #tpu.memory_space<vmem>>, vector<1x4x16x14xf32>
      %50 = vector.shape_cast %49 : vector<1x4x16x14xf32> to vector<4x16x14xf32>
      %51 = vector.shape_cast %48 : vector<4x16x14xf32> to vector<1x4x16x14xf32>
      tpu.vector_store %arg3[%c0_31, %c0_32, %c0_33, %c0_34], %51 {strides = array<i32>} : memref<1x4x16x16xf32, #tpu.memory_space<vmem>>, vector<1x4x16x14xf32>,
      %52 = vector.extract_strided_slice %47 {offsets = [0, 0, 15], sizes = [4, 16, 1], strides = [1, 1, 1]} : vector<4x16x16xf32> to vector<4x16x1xf32>
      %53 = vector.shape_cast %52 : vector<4x16x1xf32> to vector<4x16x1xf32>
      %54 = vector.broadcast %53 : vector<4x16x1xf32> to vector<4x16x2xf32>
      %c0_35 = arith.constant 0 : index
      %c0_36 = arith.constant 0 : index
      %c0_37 = arith.constant 0 : index
      %c14 = arith.constant 14 : index
      %55 = vector.load %arg3[%c0_35, %c0_36, %c0_37, %c14] : memref<1x4x16x16xf32, #tpu.memory_space<vmem>>, vector<1x4x16x2xf32>
      %56 = vector.shape_cast %55 : vector<1x4x16x2xf32> to vector<4x16x2xf32>
      %57 = vector.shape_cast %54 : vector<4x16x2xf32> to vector<1x4x16x2xf32>
      tpu.vector_store %arg3[%c0_35, %c0_36, %c0_37, %c14], %57 {strides = array<i32>} : memref<1x4x16x16xf32, #tpu.memory_space<vmem>>, vector<1x4x16x2xf32>,
    } else {
    }
    %c7_i32 = arith.constant 7 : i32
    %40 = arith.cmpi eq, %3, %c7_i32 : i32
    %41 = arith.extui %40 : i1 to i32
    %c0_i32_27 = arith.constant 0 : i32
    %42 = arith.cmpi ne, %41, %c0_i32_27 : i32
    scf.if %42 {
      %c0_29 = arith.constant 0 : index
      %46 = arith.index_cast %5 : i32 to index
      %c0_30 = arith.constant 0 : index
      %47 = vector.load %arg4[%c0_29, %46, %c0_30] : memref<4x24x16xf32, #tpu.memory_space<vmem>>, vector<4x16x16xf32>
      %48 = vector.extract_strided_slice %47 {offsets = [0, 0, 3], sizes = [4, 16, 13], strides = [1, 1, 1]} : vector<4x16x16xf32> to vector<4x16x13xf32>
      %c0_31 = arith.constant 0 : index
      %c0_32 = arith.constant 0 : index
      %c0_33 = arith.constant 0 : index
      %c0_34 = arith.constant 0 : index
      %49 = vector.load %arg3[%c0_31, %c0_32, %c0_33, %c0_34] : memref<1x4x16x16xf32, #tpu.memory_space<vmem>>, vector<1x4x16x13xf32>
      %50 = vector.shape_cast %49 : vector<1x4x16x13xf32> to vector<4x16x13xf32>
      %51 = vector.shape_cast %48 : vector<4x16x13xf32> to vector<1x4x16x13xf32>
      tpu.vector_store %arg3[%c0_31, %c0_32, %c0_33, %c0_34], %51 {strides = array<i32>} : memref<1x4x16x16xf32, #tpu.memory_space<vmem>>, vector<1x4x16x13xf32>,
      %52 = vector.extract_strided_slice %47 {offsets = [0, 0, 15], sizes = [4, 16, 1], strides = [1, 1, 1]} : vector<4x16x16xf32> to vector<4x16x1xf32>
      %53 = vector.shape_cast %52 : vector<4x16x1xf32> to vector<4x16x1xf32>
      %54 = vector.broadcast %53 : vector<4x16x1xf32> to vector<4x16x3xf32>
      %c0_35 = arith.constant 0 : index
      %c0_36 = arith.constant 0 : index
      %c0_37 = arith.constant 0 : index
      %c13 = arith.constant 13 : index
      %55 = vector.load %arg3[%c0_35, %c0_36, %c0_37, %c13] : memref<1x4x16x16xf32, #tpu.memory_space<vmem>>, vector<1x4x16x3xf32>
      %56 = vector.shape_cast %55 : vector<1x4x16x3xf32> to vector<4x16x3xf32>
      %57 = vector.shape_cast %54 : vector<4x16x3xf32> to vector<1x4x16x3xf32>
      tpu.vector_store %arg3[%c0_35, %c0_36, %c0_37, %c13], %57 {strides = array<i32>} : memref<1x4x16x16xf32, #tpu.memory_space<vmem>>, vector<1x4x16x3xf32>,
    } else {
    }
    %c8_i32 = arith.constant 8 : i32
    %43 = arith.cmpi eq, %3, %c8_i32 : i32
    %44 = arith.extui %43 : i1 to i32
    %c0_i32_28 = arith.constant 0 : i32
    %45 = arith.cmpi ne, %44, %c0_i32_28 : i32
    scf.if %45 {
      %c0_29 = arith.constant 0 : index
      %46 = arith.index_cast %5 : i32 to index
      %c0_30 = arith.constant 0 : index
      %47 = vector.load %arg4[%c0_29, %46, %c0_30] : memref<4x24x16xf32, #tpu.memory_space<vmem>>, vector<4x16x16xf32>
      %48 = vector.extract_strided_slice %47 {offsets = [0, 0, 4], sizes = [4, 16, 12], strides = [1, 1, 1]} : vector<4x16x16xf32> to vector<4x16x12xf32>
      %c0_31 = arith.constant 0 : index
      %c0_32 = arith.constant 0 : index
      %c0_33 = arith.constant 0 : index
      %c0_34 = arith.constant 0 : index
      %49 = vector.load %arg3[%c0_31, %c0_32, %c0_33, %c0_34] : memref<1x4x16x16xf32, #tpu.memory_space<vmem>>, vector<1x4x16x12xf32>
      %50 = vector.shape_cast %49 : vector<1x4x16x12xf32> to vector<4x16x12xf32>
      %51 = vector.shape_cast %48 : vector<4x16x12xf32> to vector<1x4x16x12xf32>
      tpu.vector_store %arg3[%c0_31, %c0_32, %c0_33, %c0_34], %51 {strides = array<i32>} : memref<1x4x16x16xf32, #tpu.memory_space<vmem>>, vector<1x4x16x12xf32>,
      %52 = vector.extract_strided_slice %47 {offsets = [0, 0, 15], sizes = [4, 16, 1], strides = [1, 1, 1]} : vector<4x16x16xf32> to vector<4x16x1xf32>
      %53 = vector.shape_cast %52 : vector<4x16x1xf32> to vector<4x16x1xf32>
      %54 = vector.broadcast %53 : vector<4x16x1xf32> to vector<4x16x4xf32>
      %c0_35 = arith.constant 0 : index
      %c0_36 = arith.constant 0 : index
      %c0_37 = arith.constant 0 : index
      %c12 = arith.constant 12 : index
      %55 = vector.load %arg3[%c0_35, %c0_36, %c0_37, %c12] : memref<1x4x16x16xf32, #tpu.memory_space<vmem>>, vector<1x4x16x4xf32>
      %56 = vector.shape_cast %55 : vector<1x4x16x4xf32> to vector<4x16x4xf32>
      %57 = vector.shape_cast %54 : vector<4x16x4xf32> to vector<1x4x16x4xf32>
      tpu.vector_store %arg3[%c0_35, %c0_36, %c0_37, %c12], %57 {strides = array<i32>} : memref<1x4x16x16xf32, #tpu.memory_space<vmem>>, vector<1x4x16x4xf32>,
    } else {
    }
    return
  }
  func.func @transform_0(%arg0: i32, %arg1: memref<2x2xi32, #tpu.memory_space<smem>>) -> (i32, i32, i32, i32) {
    %c0_i32 = arith.constant 0 : i32
    %c0_i32_0 = arith.constant 0 : i32
    %c0_i32_1 = arith.constant 0 : i32
    %c0_i32_2 = arith.constant 0 : i32
    return %arg0, %c0_i32, %c0_i32_0, %c0_i32_1 : i32, i32, i32, i32
  }
  func.func @transform_1(%arg0: i32, %arg1: memref<2x2xi32, #tpu.memory_space<smem>>) -> (i32, i32, i32, i32) {
    %c0_i32 = arith.constant 0 : i32
    %c0_i32_0 = arith.constant 0 : i32
    %c0_i32_1 = arith.constant 0 : i32
    %c0_i32_2 = arith.constant 0 : i32
    return %arg0, %c0_i32, %c0_i32_0, %c0_i32_1 : i32, i32, i32, i32
  }
}

</mosaic_0001>

<bundles_post_ra>
// kernel: random_shifts_aug.1
= control target key start
LH: loop header
LB: loop body
LE: loop exit
PB: predicated region body
PF: predicated region fallthrough
CT: control target
= control target key end

     0   :  { %s1782_s0 = inlined_call_operand.vmem [shape: s32[2,2], index: 0, kind: input, shape index: {}]   ;;  %s1783_s1 = inlined_call_operand.hbm [shape: f32[2,4,16,16], index: 1, kind: input, shape index: {}]   ;;  %s1784_s2 = inlined_call_operand.hbm [shape: f32[2,4,16,16], index: 2, kind: output, shape index: {}]  }
   0x1   :  { %s7_s11 = sshll.u32 %s1782_s0, 4  ;;  %s8_s11 = int_to_ptr.vmem [resolvable:$true] %s7_s11 }
   0x2   :  { %s1143_s12 = scalar_lea.vmem %s8_s11, 32  ;;  %p1148_p1 = scmp.lt.s32.totalorder %s8_s11, %s8_s11 }
   0x3   :  { %p1144_p0 = scmp.ne.s32.totalorder %s8_s11, %s1143_s12  ;;  %p1149_p2 = scmp.lt.s32.totalorder %s1143_s12, %s1143_s12 }
   0x5   :  { %p1150_p3 = por %p1149_p2, %p1148_p1 }
   0x7   :  { %p1151_p4 = pnand %p1150_p3, %p1144_p0 }
   0x9   :  { %1154 = shalt.err (!%p1151_p4)  }
   0xa   :  { %s1251_s13 = smov [#allocation4]  }
   0xb   :  { %10 = dma.vmem_to_smem %s8_s11, 32, %s1251_s13, [#allocation3] }
   0xc   :  { %1225 = dma.done.wait [#allocation3], 32 }
   0xd   :  { %1226 = vsyncadd [#allocation3], 4294967264 }
   0xe   :  { %12 = sfence }
   0xf   :  { %13 = vsyncpa [#allocation6], 0 }
  0x10   :  { %15 = vsyncpa [#allocation6 + $0x1], 0 }
  0x11   :  { %16 = vsyncpa [#allocation7], 0 }
  0x12   :  { %18 = vsyncpa [#allocation7 + $0x1], 0  ;;  %s1290_s14 = smov 0   ;;  %s1292_s0 = smov 0  }
  0x13   :  { %s1294_s15 = smov 0   ;;  %s1296_s16 = smov 0  }
  0x14 LB: > { %s1311_s17 = sadd.s32 4294967295, %s1249_s16   ;;  %s1030_s18 = sadd.s32 4294967294, %s1249_s16   ;;  %s1249_s16 = sphi %s1296_s16, %s1799_s16   ;;  %s1245_s15 = sphi %s1294_s15, %s1798_s15   ;;  %s1241_s0 = sphi %s1292_s0, %s1797_s0   ;;  %s1237_s14 = sphi %s1290_s14, %s1796_s14  }
  0x15   : > { %s1315_s19 = sadd.s32 1, %s1249_s16   ;;  %s31_s20 = sadd.s32 1, %s1245_s15 }
  0x16   : > { %s28_s21 = ssub.s32 %s1249_s16, %s1315_s19  ;;  %p38_p5 = scmp.ne.s32.totalorder %s1245_s15, %s1241_s0 }
  0x17   : > { %p29_p6 = scmp.eq.s32.totalorder %s28_s21, 0  ;;  %p39_p7 = scmp.eq.s32.totalorder %s1249_s16, 0 }
  0x18   : > { %p44_p8 = scmp.ne.s32.totalorder %s1241_s0, %s1237_s14  ;;  %p45_p9 = scmp.eq.s32.totalorder %s1311_s17, 0 }
  0x19   : > { %s1327_s22 = scalar_select %p29_p6, %s1245_s15, %s31_s20  }
  0x1a   : > { %p1329_p10 = por %p39_p7, %p38_p5  ;;  %p1333_p11 = por %p45_p9, %p44_p8 }
  0x1b   : > { %p68_p12 = scmp.eq.s32.totalorder %s1311_s17, 1  ;;  %p74_p13 = scmp.eq.s32.totalorder %s1030_s18, 1 }
  0x1c   : > { %s1788_s24 = scalar_select %p1333_p11, 1, 0 }
  0x1d   : > { %p1078_p1 = scmp.lt.s32.totalorder %s1249_s16, 2  ;;  %p1340_p2 = por %p68_p12, %p38_p5 }
  0x1e   : > { %p1344_p3 = por %p74_p13, %p44_p8  ;;  %s94_s27 = sand.u32 1, %s1245_s15  }
  0x1f   : > { %s1789_s25 = scalar_select %p1340_p2, 1, 0 }
  0x20   : > { %s1790_s26 = scalar_select %p1344_p3, 1, 0 }
  0x21   : > { %s1062_s28 = sshll.u32 %s1249_s16, 10  ;;  %s1033_s29 = sshll.u32 %s94_s27, 6 }
  0x22   : > { %s1353_s4 = scalar_lea.hbm %s1783_s1, %s1062_s28  ;;  %s98_s5 = scalar_lea.vmem [#allocation5], %s1033_s29 }
  0x23   : > { %s105_s6 = sshll.u32 %s98_s5, 4  ;;  %p1357_p4 = pnand %p1078_p1, %p1329_p10  ;;  %s1361_s6 = int_to_ptr.vmem [resolvable:$true] %s105_s6 }
  0x24   : > { %s1363_s8 = scalar_lea.sflag [#allocation6], %s94_s27  ;;  %s1155_s9 = scalar_lea.hbm %s1353_s4, 1024 }
  0x25   : > { %p1156_p5 = scmp.ne.s32.totalorder %s1353_s4, %s1155_s9  ;;  %p1157_p6 = pneg %p1357_p4 }
  0x26   : > { %s1160_s12 = scalar_lea.hbm %s1783_s1, 2048  ;;  %p1161_p9 = scmp.lt.s32.totalorder %s1353_s4, %s1783_s1 }
  0x27   : > { %p1158_p7 = pnand %p1157_p6, %p1156_p5  ;;  %p1162_p10 = scmp.lt.s32.totalorder %s1160_s12, %s1155_s9 }
  0x29   : > { %p1159_p8 = pneg %p1158_p7  ;;  %p1163_p12 = por %p1162_p10, %p1161_p9 }
  0x2b   : > { %p1164_p13 = pnand %p1163_p12, %p1159_p8 }
  0x2d   : > { %1167 = shalt.err (!%p1164_p13)
}
  0x2e   : > { %s1168_s20 = scalar_lea.vmem %s1361_s6, 1024  ;;  %s1252_s21 = smov [#allocation5]  }
  0x2f   : > { %p1169_p1 = scmp.ne.s32.totalorder %s1361_s6, %s1168_s20  ;;  %s1173_s23 = sshll.u32 %s1252_s21, 4  ;;  %s1174_s23 = int_to_ptr.vmem [resolvable:$false] %s1173_s23 }
  0x30   : > { %s1175_s27 = scalar_lea.vmem %s1174_s23, 2048  ;;  %p1176_p7 = scmp.lt.s32.totalorder %s1361_s6, %s1174_s23 }
  0x31   : > { %p1171_p0 = pnand %p1169_p1, %p1157_p6  ;;  %p1177_p3 = scmp.lt.s32.totalorder %s1175_s27, %s1168_s20 }
  0x33   : > { %p1172_p5 = pneg %p1171_p0  ;;  %p1178_p2 = por %p1177_p3, %p1176_p7 }
  0x35   : > { %p1179_p11 = pnand %p1178_p2, %p1172_p5 }
  0x37   : > { %1182 = shalt.err (!%p1179_p11)
}
  0x38   : > { %s1253_s28 = smov 128   ;;  %s1254_s29 = smov 8  }
  0x39   : > { %1073 = dma.hbm_to_vmem [thread:$0]  (!%p1357_p4), %s1353_s4, 1024, %s1361_s6, %s1363_s8, %s1253_s28, %s1253_s28, %s1254_s29  }
  0x3a   : > { %p1036_p0 = scmp.ge.s32.totalorder %s1249_s16, 1  ;;  %p113_p6 = scmp.lt.s32.totalorder %s1249_s16, 3 }
  0x3c   : > { %p114_p8 = pnand %p1036_p0, %p113_p6 }
  0x3d   : > { %s1387_s30 = sand.u32 (!%p114_p8), 1, %s1241_s0   ;;  %p1792_p11 = scmp.ne.s32.totalorder (!%p114_p8), %s1788_s24, 0 }
  0x3e   : > { %117 = sbr.rel (%p114_p8) target bundleno = 1363 (0x553), region = 24  ;;  %s1037_s3 = sshll.u32 (!%p114_p8), %s1387_s30, 6 }
  0x3f   : > { %s120_s5 = scalar_lea.sflag (!%p114_p8), [#allocation6], %s1387_s30  ;;  %s1393_s9 = scalar_lea.vmem (!%p114_p8), [#allocation5], %s1037_s3 }
  0x43   : > { %1228 = dma.done.wait (%p1792_p11), %s120_s5, 1024  }
  0x44   : > { %1230 = vsyncadd (%p1792_p11), %s120_s5, 4294966272  ;;  %s143_s4 = sshra.s32 %s1311_s17, 7  ;;  %s148_s6 = sand.u32 127, %s1311_s17  ;;  %vm171_vm0 = vcmask 125952   ;;  %vm208_vm1 = vcmask 130048   ;;  %v200_v8 = vld [vmem:[%s1393_s9] sm:$0xff] }
  0x45   : > { %s1402_s7 = sld [smem:[#allocation4 + %s1311_s17]]  ;;  %s1063_s8 = sshll.u32 %s143_s4, 7  ;;  %v1040_v0 = vld [vmem:[%s1393_s9] ss:$0 sm:$0xff]  ;;  %v1041_v1 = vld [vmem:[%s1393_s9 + $0x10] ss:$0 sm:$0xff] }
  0x46   : > { %s1064_s10 = sadd.s32 128, %s1063_s8  ;;  %v1042_v2 = vld [vmem:[%s1393_s9 + $0x20] ss:$0 sm:$0xff]  ;;  %172 = vst.msk [vmem:[#allocation2] sm:$0xf] %vm171_vm0, %v1040_v0  ;;  %v201_v9 = vld [vmem:[%s1393_s9 + $0x8] sm:$0xff] }
  0x47   : > { %s149_s11 = sadd.s32 %s1064_s10, %s148_s6  ;;  %173 = vst.msk [vmem:[#allocation2 + $0x18] sm:$0xf] %vm171_vm0, %v1041_v1  ;;  %174 = vst.msk [vmem:[#allocation2 + $0x30] sm:$0xf] %vm171_vm0, %v1042_v2  ;;  %v1043_v3 = vld [vmem:[%s1393_s9 + $0x30] ss:$0 sm:$0xff] }
  0x48   : > { %s1404_s12 = sld [smem:[#allocation4 + %s149_s11]]  ;;  %v1044_v4 = vld [vmem:[%s1393_s9 + $0xf] ss:$0 sm:$0xff]  ;;  %v1045_v5 = vld [vmem:[%s1393_s9 + $0x1f] ss:$0 sm:$0xff]  ;;  %209 = vst.msk [vmem:[#allocation2 + $0x4] sm:$0xff] %vm208_vm1, %v200_v8 }
  0x49   : > { %175 = vst.msk [vmem:[#allocation2 + $0x48] sm:$0xf] %vm171_vm0, %v1043_v3  ;;  %196 = vst.msk [vmem:[#allocation2 + $0x14] sm:$0xf] %vm171_vm0, %v1044_v4  ;;  %v1046_v6 = vld [vmem:[%s1393_s9 + $0x2f] ss:$0 sm:$0xff] }
  0x4a   : > { %197 = vst.msk [vmem:[#allocation2 + $0x2c] sm:$0xf] %vm171_vm0, %v1045_v5  ;;  %v1047_v7 = vld [vmem:[%s1393_s9 + $0x3f] ss:$0 sm:$0xff]  ;;  %198 = vst.msk [vmem:[#allocation2 + $0x44] sm:$0xf] %vm171_vm0, %v1046_v6 }
  0x4b   : > { %199 = vst.msk [vmem:[#allocation2 + $0x5c] sm:$0xf] %vm171_vm0, %v1047_v7  ;;  %v202_v10 = vld [vmem:[%s1393_s9 + $0x10] sm:$0xff]  ;;  %v203_v11 = vld [vmem:[%s1393_s9 + $0x18] sm:$0xff]  ;;  %v204_v12 = vld [vmem:[%s1393_s9 + $0x20] sm:$0xff]  ;;  %s1440_s24 = scalar_lea.vmem [#allocation8], %s1037_s3 }
  0x4c   : > { %210 = vst.msk [vmem:[#allocation2 + $0xc] sm:$0xff] %vm208_vm1, %v201_v9  ;;  %211 = vst.msk [vmem:[#allocation2 + $0x1c] sm:$0xff] %vm208_vm1, %v202_v10  ;;  %v205_v13 = vld [vmem:[%s1393_s9 + $0x28] sm:$0xff]  ;;  %v206_v14 = vld [vmem:[%s1393_s9 + $0x30] sm:$0xff]  ;;  %p1048_p2 = scmp.ne.s32.totalorder %s1402_s7, 0 }
  0x4d   : > { %212 = vst.msk [vmem:[#allocation2 + $0x24] sm:$0xff] %vm208_vm1, %v203_v11  ;;  %213 = vst.msk [vmem:[#allocation2 + $0x34] sm:$0xff] %vm208_vm1, %v204_v12  ;;  %v207_v15 = vld [vmem:[%s1393_s9 + $0x38] sm:$0xff]  ;;  %s1256_s18 = smov (!%p1048_p2), 4  }
  0x4e   : > { %214 = vst.msk [vmem:[#allocation2 + $0x3c] sm:$0xff] %vm208_vm1, %v205_v13  ;;  %215 = vst.msk [vmem:[#allocation2 + $0x4c] sm:$0xff] %vm208_vm1, %v206_v14  ;;  %220 = sbr.rel (%p1048_p2) target bundleno = 240 (0xf0), region = 32  ;;  %s221_s13 = scalar_lea.vmem (!%p1048_p2), [#allocation2], %s1404_s12 }
  0x4f   : > { %216 = vst.msk [vmem:[#allocation2 + $0x54] sm:$0xff] %vm208_vm1, %v207_v15 }
  0x53   : > { %v1255_v16 = vmov 0   ;;  %vm270_vm2 = vcmask 31744   ;;  %vm303_vm3 = vcmask 130080  }
  0x54   : > { %1132 = vset.pattern.permute.xlu1 %v1255_v16  ;;  %1131 = vset.pattern.permute.xlu0 %v1255_v16 }
  0x56   : > { %v224_v17 = vld [vmem:[%s221_s13 + $0x18] sm:$0xff]  ;;  %v222_v18 = vld [vmem:[%s221_s13] sm:$0xff]  ;;  %v223_v20 = vld [vmem:[%s221_s13 + $0x8] sm:$0xff] }
  0x57   : > { %242 = vperm.xlu1 %1132, %v224_v17   ;;  %232 = vperm.xlu0 %1131, %v222_v18   ;;  %v225_v19 = vld [vmem:[%s221_s13 + $0x20] sm:$0xff]  ;;  %v227_v21 = vld [vmem:[%s221_s13 + $0x38] sm:$0xff]  ;;  %v226_v22 = vld [vmem:[%s221_s13 + $0x30] sm:$0xff] }
  0x58   : > { %v229_v23 = vld [vmem:[%s221_s13 + $0x50] sm:$0xff]  ;;  %v228_v24 = vld [vmem:[%s221_s13 + $0x48] sm:$0xff] }
  0x5b   : > { %247 = vperm.xlu1 %1132, %v225_v19   ;;  %237 = vperm.xlu0 %1131, %v223_v20  }
  0x5f   : > { %257 = vperm.xlu1 %1132, %v227_v21   ;;  %252 = vperm.xlu0 %1131, %v226_v22  }
  0x63   : > { %267 = vperm.xlu1 %1132, %v229_v23   ;;  %262 = vperm.xlu0 %1131, %v228_v24  }
  0x67   : > { %281 = vrot.lane.b32.xlu1 %v223_v20, %s1256_s18  ;;  %279 = vrot.lane.b32.xlu0 %v222_v18, %s1256_s18 }
  0x6b   : > { %285 = vrot.lane.b32.xlu1 %v225_v19, %s1256_s18  ;;  %283 = vrot.lane.b32.xlu0 %v224_v17, %s1256_s18 }
  0x6f   : > { %289 = vrot.lane.b32.xlu1 %v227_v21, %s1256_s18  ;;  %287 = vrot.lane.b32.xlu0 %v226_v22, %s1256_s18 }
  0x73   : > { %293 = vrot.lane.b32.xlu1 %v229_v23, %s1256_s18  ;;  %291 = vrot.lane.b32.xlu0 %v228_v24, %s1256_s18 }
  0xd2   : > { %v243_v25 = vpop.permute.xlu1 %242  ;;  %v233_v26 = vpop.permute.xlu0 %232 }
  0xd3   : > { %273 = vst.msk [vmem:[%s1440_s24 + $0x10] sm:$0xff] %vm270_vm2, %v243_v25  ;;  %271 = vst.msk [vmem:[%s1440_s24] sm:$0xff] %vm270_vm2, %v233_v26 }
  0xd6   : > { %v248_v27 = vpop.permute.xlu1 %247  ;;  %v238_v28 = vpop.permute.xlu0 %237 }
  0xd7   : > { %274 = vst.msk [vmem:[%s1440_s24 + $0x18] sm:$0xff] %vm270_vm2, %v248_v27  ;;  %272 = vst.msk [vmem:[%s1440_s24 + $0x8] sm:$0xff] %vm270_vm2, %v238_v28 }
  0xda   : > { %v258_v29 = vpop.permute.xlu1 %257  ;;  %v253_v30 = vpop.permute.xlu0 %252 }
  0xdb   : > { %276 = vst.msk [vmem:[%s1440_s24 + $0x28] sm:$0xff] %vm270_vm2, %v258_v29  ;;  %275 = vst.msk [vmem:[%s1440_s24 + $0x20] sm:$0xff] %vm270_vm2, %v253_v30 }
  0xde   : > { %v268_v31 = vpop.permute.xlu1 %267  ;;  %v263_v32 = vpop.permute.xlu0 %262 }
  0xdf   : > { %278 = vst.msk [vmem:[%s1440_s24 + $0x38] sm:$0xff] %vm270_vm2, %v268_v31  ;;  %277 = vst.msk [vmem:[%s1440_s24 + $0x30] sm:$0xff] %vm270_vm2, %v263_v32 }
  0xe2   : > { %v282_v33 = vpop.permute.xlu1 %281  ;;  %v280_v34 = vpop.permute.xlu0 %279 }
  0xe3   : > { %305 = vst.msk [vmem:[%s1440_s24 + $0x8] sm:$0xff] %vm303_vm3, %v282_v33  ;;  %304 = vst.msk [vmem:[%s1440_s24] sm:$0xff] %vm303_vm3, %v280_v34 }
  0xe6   : > { %v286_v35 = vpop.permute.xlu1 %285  ;;  %v284_v36 = vpop.permute.xlu0 %283 }
  0xe7   : > { %307 = vst.msk [vmem:[%s1440_s24 + $0x18] sm:$0xff] %vm303_vm3, %v286_v35  ;;  %306 = vst.msk [vmem:[%s1440_s24 + $0x10] sm:$0xff] %vm303_vm3, %v284_v36 }
  0xea   : > { %v290_v37 = vpop.permute.xlu1 %289  ;;  %v288_v38 = vpop.permute.xlu0 %287 }
  0xeb   : > { %309 = vst.msk [vmem:[%s1440_s24 + $0x28] sm:$0xff] %vm303_vm3, %v290_v37  ;;  %308 = vst.msk [vmem:[%s1440_s24 + $0x20] sm:$0xff] %vm303_vm3, %v288_v38 }
  0xee   : > { %v294_v39 = vpop.permute.xlu1 %293  ;;  %v292_v40 = vpop.permute.xlu0 %291 }
  0xef   : > { %311 = vst.msk [vmem:[%s1440_s24 + $0x38] sm:$0xff] %vm303_vm3, %v294_v39  ;;  %310 = vst.msk [vmem:[%s1440_s24 + $0x30] sm:$0xff] %vm303_vm3, %v292_v40 }
  0xf0 PF: > { %p1049_p3 = scmp.ne.s32.totalorder %s1402_s7, 1 }
  0xf1   : > { %s316_s20 = scalar_lea.vmem (!%p1049_p3), [#allocation2], %s1404_s12  ;;  %s1258_s21 = smov (!%p1049_p3), 3  }
  0xf2   : > { %315 = sbr.rel (%p1049_p3) target bundleno = 402 (0x192), region = 36 }
  0xf7   : > { %v1257_v41 = vmov 0   ;;  %v319_v42 = vld [vmem:[%s316_s20 + $0x18] sm:$0xff]  ;;  %v317_v43 = vld [vmem:[%s316_s20] sm:$0xff]  ;;  %v318_v45 = vld [vmem:[%s316_s20 + $0x8] sm:$0xff]  ;;  %vm365_vm4 = vcmask 23552   ;;  %vm398_vm5 = vcmask 130072  }
  0xf8   : > { %1134 = vset.pattern.permute.xlu1 %v1257_v41  ;;  %1133 = vset.pattern.permute.xlu0 %v1257_v41  ;;  %v320_v44 = vld [vmem:[%s316_s20 + $0x20] sm:$0xff]  ;;  %v322_v46 = vld [vmem:[%s316_s20 + $0x38] sm:$0xff]  ;;  %v321_v47 = vld [vmem:[%s316_s20 + $0x30] sm:$0xff] }
  0xf9   : > { %337 = vperm.xlu1 %1134, %v319_v42   ;;  %327 = vperm.xlu0 %1133, %v317_v43   ;;  %v324_v48 = vld [vmem:[%s316_s20 + $0x50] sm:$0xff]  ;;  %v323_v49 = vld [vmem:[%s316_s20 + $0x48] sm:$0xff] }
  0xfd   : > { %342 = vperm.xlu1 %1134, %v320_v44   ;;  %332 = vperm.xlu0 %1133, %v318_v45  }
 0x101   : > { %352 = vperm.xlu1 %1134, %v322_v46   ;;  %347 = vperm.xlu0 %1133, %v321_v47  }
 0x105   : > { %362 = vperm.xlu1 %1134, %v324_v48   ;;  %357 = vperm.xlu0 %1133, %v323_v49  }
 0x109   : > { %376 = vrot.lane.b32.xlu1 %v318_v45, %s1258_s21  ;;  %374 = vrot.lane.b32.xlu0 %v317_v43, %s1258_s21 }
 0x10d   : > { %380 = vrot.lane.b32.xlu1 %v320_v44, %s1258_s21  ;;  %378 = vrot.lane.b32.xlu0 %v319_v42, %s1258_s21 }
 0x111   : > { %384 = vrot.lane.b32.xlu1 %v322_v46, %s1258_s21  ;;  %382 = vrot.lane.b32.xlu0 %v321_v47, %s1258_s21 }
 0x115   : > { %388 = vrot.lane.b32.xlu1 %v324_v48, %s1258_s21  ;;  %386 = vrot.lane.b32.xlu0 %v323_v49, %s1258_s21 }
 0x174   : > { %v338_v50 = vpop.permute.xlu1 %337  ;;  %v328_v51 = vpop.permute.xlu0 %327 }
 0x175   : > { %368 = vst.msk [vmem:[%s1440_s24 + $0x10] sm:$0xff] %vm365_vm4, %v338_v50  ;;  %366 = vst.msk [vmem:[%s1440_s24] sm:$0xff] %vm365_vm4, %v328_v51 }
 0x178   : > { %v343_v52 = vpop.permute.xlu1 %342  ;;  %v333_v53 = vpop.permute.xlu0 %332 }
 0x179   : > { %369 = vst.msk [vmem:[%s1440_s24 + $0x18] sm:$0xff] %vm365_vm4, %v343_v52  ;;  %367 = vst.msk [vmem:[%s1440_s24 + $0x8] sm:$0xff] %vm365_vm4, %v333_v53 }
 0x17c   : > { %v353_v54 = vpop.permute.xlu1 %352  ;;  %v348_v55 = vpop.permute.xlu0 %347 }
 0x17d   : > { %371 = vst.msk [vmem:[%s1440_s24 + $0x28] sm:$0xff] %vm365_vm4, %v353_v54  ;;  %370 = vst.msk [vmem:[%s1440_s24 + $0x20] sm:$0xff] %vm365_vm4, %v348_v55 }
 0x180   : > { %v363_v56 = vpop.permute.xlu1 %362  ;;  %v358_v57 = vpop.permute.xlu0 %357 }
 0x181   : > { %373 = vst.msk [vmem:[%s1440_s24 + $0x38] sm:$0xff] %vm365_vm4, %v363_v56  ;;  %372 = vst.msk [vmem:[%s1440_s24 + $0x30] sm:$0xff] %vm365_vm4, %v358_v57 }
 0x184   : > { %v377_v58 = vpop.permute.xlu1 %376  ;;  %v375_v59 = vpop.permute.xlu0 %374 }
 0x185   : > { %400 = vst.msk [vmem:[%s1440_s24 + $0x8] sm:$0xff] %vm398_vm5, %v377_v58  ;;  %399 = vst.msk [vmem:[%s1440_s24] sm:$0xff] %vm398_vm5, %v375_v59 }
 0x188   : > { %v381_v60 = vpop.permute.xlu1 %380  ;;  %v379_v61 = vpop.permute.xlu0 %378 }
 0x189   : > { %402 = vst.msk [vmem:[%s1440_s24 + $0x18] sm:$0xff] %vm398_vm5, %v381_v60  ;;  %401 = vst.msk [vmem:[%s1440_s24 + $0x10] sm:$0xff] %vm398_vm5, %v379_v61 }
 0x18c   : > { %v385_v62 = vpop.permute.xlu1 %384  ;;  %v383_v63 = vpop.permute.xlu0 %382 }
 0x18d   : > { %404 = vst.msk [vmem:[%s1440_s24 + $0x28] sm:$0xff] %vm398_vm5, %v385_v62  ;;  %403 = vst.msk [vmem:[%s1440_s24 + $0x20] sm:$0xff] %vm398_vm5, %v383_v63 }
 0x190   : > { %v389_v0 = vpop.permute.xlu1 %388  ;;  %v387_v1 = vpop.permute.xlu0 %386 }
 0x191   : > { %406 = vst.msk [vmem:[%s1440_s24 + $0x38] sm:$0xff] %vm398_vm5, %v389_v0  ;;  %405 = vst.msk [vmem:[%s1440_s24 + $0x30] sm:$0xff] %vm398_vm5, %v387_v1 }
 0x192 PF: > { %p1050_p4 = scmp.ne.s32.totalorder %s1402_s7, 2 }
 0x193   : > { %s411_s23 = scalar_lea.vmem (!%p1050_p4), [#allocation2], %s1404_s12  ;;  %s1260_s27 = smov (!%p1050_p4), 2  }
 0x194   : > { %410 = sbr.rel (%p1050_p4) target bundleno = 564 (0x234), region = 40 }
 0x199   : > { %v1259_v2 = vmov 0   ;;  %v414_v3 = vld [vmem:[%s411_s23 + $0x18] sm:$0xff]  ;;  %v412_v4 = vld [vmem:[%s411_s23] sm:$0xff]  ;;  %v413_v6 = vld [vmem:[%s411_s23 + $0x8] sm:$0xff]  ;;  %vm460_vm6 = vcmask 15360   ;;  %vm493_vm7 = vcmask 130064  }
 0x19a   : > { %1136 = vset.pattern.permute.xlu1 %v1259_v2  ;;  %1135 = vset.pattern.permute.xlu0 %v1259_v2  ;;  %v415_v5 = vld [vmem:[%s411_s23 + $0x20] sm:$0xff]  ;;  %v417_v7 = vld [vmem:[%s411_s23 + $0x38] sm:$0xff]  ;;  %v416_v8 = vld [vmem:[%s411_s23 + $0x30] sm:$0xff] }
 0x19b   : > { %432 = vperm.xlu1 %1136, %v414_v3   ;;  %422 = vperm.xlu0 %1135, %v412_v4   ;;  %v419_v9 = vld [vmem:[%s411_s23 + $0x50] sm:$0xff]  ;;  %v418_v10 = vld [vmem:[%s411_s23 + $0x48] sm:$0xff] }
 0x19f   : > { %437 = vperm.xlu1 %1136, %v415_v5   ;;  %427 = vperm.xlu0 %1135, %v413_v6  }
 0x1a3   : > { %447 = vperm.xlu1 %1136, %v417_v7   ;;  %442 = vperm.xlu0 %1135, %v416_v8  }
 0x1a7   : > { %457 = vperm.xlu1 %1136, %v419_v9   ;;  %452 = vperm.xlu0 %1135, %v418_v10  }
 0x1ab   : > { %471 = vrot.lane.b32.xlu1 %v413_v6, %s1260_s27  ;;  %469 = vrot.lane.b32.xlu0 %v412_v4, %s1260_s27 }
 0x1af   : > { %475 = vrot.lane.b32.xlu1 %v415_v5, %s1260_s27  ;;  %473 = vrot.lane.b32.xlu0 %v414_v3, %s1260_s27 }
 0x1b3   : > { %479 = vrot.lane.b32.xlu1 %v417_v7, %s1260_s27  ;;  %477 = vrot.lane.b32.xlu0 %v416_v8, %s1260_s27 }
 0x1b7   : > { %483 = vrot.lane.b32.xlu1 %v419_v9, %s1260_s27  ;;  %481 = vrot.lane.b32.xlu0 %v418_v10, %s1260_s27 }
 0x216   : > { %v433_v11 = vpop.permute.xlu1 %432  ;;  %v423_v12 = vpop.permute.xlu0 %422 }
 0x217   : > { %463 = vst.msk [vmem:[%s1440_s24 + $0x10] sm:$0xff] %vm460_vm6, %v433_v11  ;;  %461 = vst.msk [vmem:[%s1440_s24] sm:$0xff] %vm460_vm6, %v423_v12 }
 0x21a   : > { %v438_v13 = vpop.permute.xlu1 %437  ;;  %v428_v14 = vpop.permute.xlu0 %427 }
 0x21b   : > { %464 = vst.msk [vmem:[%s1440_s24 + $0x18] sm:$0xff] %vm460_vm6, %v438_v13  ;;  %462 = vst.msk [vmem:[%s1440_s24 + $0x8] sm:$0xff] %vm460_vm6, %v428_v14 }
 0x21e   : > { %v448_v15 = vpop.permute.xlu1 %447  ;;  %v443_v16 = vpop.permute.xlu0 %442 }
 0x21f   : > { %466 = vst.msk [vmem:[%s1440_s24 + $0x28] sm:$0xff] %vm460_vm6, %v448_v15  ;;  %465 = vst.msk [vmem:[%s1440_s24 + $0x20] sm:$0xff] %vm460_vm6, %v443_v16 }
 0x222   : > { %v458_v17 = vpop.permute.xlu1 %457  ;;  %v453_v18 = vpop.permute.xlu0 %452 }
 0x223   : > { %468 = vst.msk [vmem:[%s1440_s24 + $0x38] sm:$0xff] %vm460_vm6, %v458_v17  ;;  %467 = vst.msk [vmem:[%s1440_s24 + $0x30] sm:$0xff] %vm460_vm6, %v453_v18 }
 0x226   : > { %v472_v19 = vpop.permute.xlu1 %471  ;;  %v470_v20 = vpop.permute.xlu0 %469 }
 0x227   : > { %495 = vst.msk [vmem:[%s1440_s24 + $0x8] sm:$0xff] %vm493_vm7, %v472_v19  ;;  %494 = vst.msk [vmem:[%s1440_s24] sm:$0xff] %vm493_vm7, %v470_v20 }
 0x22a   : > { %v476_v21 = vpop.permute.xlu1 %475  ;;  %v474_v22 = vpop.permute.xlu0 %473 }
 0x22b   : > { %497 = vst.msk [vmem:[%s1440_s24 + $0x18] sm:$0xff] %vm493_vm7, %v476_v21  ;;  %496 = vst.msk [vmem:[%s1440_s24 + $0x10] sm:$0xff] %vm493_vm7, %v474_v22 }
 0x22e   : > { %v480_v23 = vpop.permute.xlu1 %479  ;;  %v478_v24 = vpop.permute.xlu0 %477 }
 0x22f   : > { %499 = vst.msk [vmem:[%s1440_s24 + $0x28] sm:$0xff] %vm493_vm7, %v480_v23  ;;  %498 = vst.msk [vmem:[%s1440_s24 + $0x20] sm:$0xff] %vm493_vm7, %v478_v24 }
 0x232   : > { %v484_v25 = vpop.permute.xlu1 %483  ;;  %v482_v26 = vpop.permute.xlu0 %481 }
 0x233   : > { %501 = vst.msk [vmem:[%s1440_s24 + $0x38] sm:$0xff] %vm493_vm7, %v484_v25  ;;  %500 = vst.msk [vmem:[%s1440_s24 + $0x30] sm:$0xff] %vm493_vm7, %v482_v26 }
 0x234 PF: > { %p1051_p9 = scmp.ne.s32.totalorder %s1402_s7, 3 }
 0x235   : > { %s506_s28 = scalar_lea.vmem (!%p1051_p9), [#allocation2], %s1404_s12  ;;  %s1261_s29 = smov (!%p1051_p9), 1  }
 0x236   : > { %505 = sbr.rel (%p1051_p9) target bundleno = 700 (0x2bc), region = 44 }
 0x23b   : > { %vm515_vm8 = vcmask 7168   ;;  %v509_v27 = vld [vmem:[%s506_s28 + $0x18] sm:$0xff]  ;;  %v507_v28 = vld [vmem:[%s506_s28] sm:$0xff]  ;;  %v508_v30 = vld [vmem:[%s506_s28 + $0x8] sm:$0xff]  ;;  %vm556_vm9 = vcmask 130056  }
 0x23c   : > { %v510_v29 = vld [vmem:[%s506_s28 + $0x20] sm:$0xff]  ;;  %536 = vrot.lane.b32.xlu1 %v509_v27, %s1261_s29  ;;  %518 = vst.msk [vmem:[%s1440_s24 + $0x10] sm:$0xff] %vm515_vm8, %v509_v27  ;;  %532 = vrot.lane.b32.xlu0 %v507_v28, %s1261_s29 }
 0x23d   : > { %516 = vst.msk [vmem:[%s1440_s24] sm:$0xff] %vm515_vm8, %v507_v28  ;;  %519 = vst.msk [vmem:[%s1440_s24 + $0x18] sm:$0xff] %vm515_vm8, %v510_v29  ;;  %v512_v31 = vld [vmem:[%s506_s28 + $0x38] sm:$0xff]  ;;  %v511_v32 = vld [vmem:[%s506_s28 + $0x30] sm:$0xff] }
 0x23e   : > { %517 = vst.msk [vmem:[%s1440_s24 + $0x8] sm:$0xff] %vm515_vm8, %v508_v30  ;;  %521 = vst.msk [vmem:[%s1440_s24 + $0x28] sm:$0xff] %vm515_vm8, %v512_v31  ;;  %v514_v33 = vld [vmem:[%s506_s28 + $0x50] sm:$0xff]  ;;  %v513_v34 = vld [vmem:[%s506_s28 + $0x48] sm:$0xff] }
 0x23f   : > { %520 = vst.msk [vmem:[%s1440_s24 + $0x20] sm:$0xff] %vm515_vm8, %v511_v32  ;;  %523 = vst.msk [vmem:[%s1440_s24 + $0x38] sm:$0xff] %vm515_vm8, %v514_v33 }
 0x240   : > { %522 = vst.msk [vmem:[%s1440_s24 + $0x30] sm:$0xff] %vm515_vm8, %v513_v34  ;;  %538 = vrot.lane.b32.xlu1 %v510_v29, %s1261_s29  ;;  %534 = vrot.lane.b32.xlu0 %v508_v30, %s1261_s29 }
 0x244   : > { %542 = vrot.lane.b32.xlu1 %v512_v31, %s1261_s29  ;;  %540 = vrot.lane.b32.xlu0 %v511_v32, %s1261_s29 }
 0x248   : > { %546 = vrot.lane.b32.xlu1 %v514_v33, %s1261_s29  ;;  %544 = vrot.lane.b32.xlu0 %v513_v34, %s1261_s29 }
 0x2ae   : > { %v537_v35 = vpop.permute.xlu1 %536  ;;  %v533_v36 = vpop.permute.xlu0 %532 }
 0x2af   : > { %559 = vst.msk [vmem:[%s1440_s24 + $0x10] sm:$0xff] %vm556_vm9, %v537_v35  ;;  %557 = vst.msk [vmem:[%s1440_s24] sm:$0xff] %vm556_vm9, %v533_v36 }
 0x2b2   : > { %v539_v37 = vpop.permute.xlu1 %538  ;;  %v535_v38 = vpop.permute.xlu0 %534 }
 0x2b3   : > { %560 = vst.msk [vmem:[%s1440_s24 + $0x18] sm:$0xff] %vm556_vm9, %v539_v37  ;;  %558 = vst.msk [vmem:[%s1440_s24 + $0x8] sm:$0xff] %vm556_vm9, %v535_v38 }
 0x2b6   : > { %v543_v39 = vpop.permute.xlu1 %542  ;;  %v541_v40 = vpop.permute.xlu0 %540 }
 0x2b7   : > { %562 = vst.msk [vmem:[%s1440_s24 + $0x28] sm:$0xff] %vm556_vm9, %v543_v39  ;;  %561 = vst.msk [vmem:[%s1440_s24 + $0x20] sm:$0xff] %vm556_vm9, %v541_v40 }
 0x2ba   : > { %v547_v41 = vpop.permute.xlu1 %546  ;;  %v545_v42 = vpop.permute.xlu0 %544 }
 0x2bb   : > { %564 = vst.msk [vmem:[%s1440_s24 + $0x38] sm:$0xff] %vm556_vm9, %v547_v41  ;;  %563 = vst.msk [vmem:[%s1440_s24 + $0x30] sm:$0xff] %vm556_vm9, %v545_v42 }
 0x2bc PF: > { %p1052_p10 = scmp.ne.s32.totalorder %s1402_s7, 4 }
 0x2bd   : > { %s569_s3 = scalar_lea.vmem (!%p1052_p10), [#allocation2], %s1404_s12 }
 0x2be   : > { %568 = sbr.rel (%p1052_p10) target bundleno = 712 (0x2c8), region = 48 }
 0x2c3   : > { %v570_v43 = vld [vmem:[%s569_s3] sm:$0xff]  ;;  %v571_v44 = vld [vmem:[%s569_s3 + $0x8] sm:$0xff]  ;;  %v572_v45 = vld [vmem:[%s569_s3 + $0x18] sm:$0xff] }
 0x2c4   : > { %578 = vst.msk [vmem:[%s1440_s24] sm:$0xff] %vm208_vm1, %v570_v43  ;;  %579 = vst.msk [vmem:[%s1440_s24 + $0x8] sm:$0xff] %vm208_vm1, %v571_v44  ;;  %v573_v46 = vld [vmem:[%s569_s3 + $0x20] sm:$0xff]  ;;  %v574_v47 = vld [vmem:[%s569_s3 + $0x30] sm:$0xff] }
 0x2c5   : > { %580 = vst.msk [vmem:[%s1440_s24 + $0x10] sm:$0xff] %vm208_vm1, %v572_v45  ;;  %v575_v48 = vld [vmem:[%s569_s3 + $0x38] sm:$0xff]  ;;  %581 = vst.msk [vmem:[%s1440_s24 + $0x18] sm:$0xff] %vm208_vm1, %v573_v46  ;;  %v576_v49 = vld [vmem:[%s569_s3 + $0x48] sm:$0xff] }
 0x2c6   : > { %582 = vst.msk [vmem:[%s1440_s24 + $0x20] sm:$0xff] %vm208_vm1, %v574_v47  ;;  %583 = vst.msk [vmem:[%s1440_s24 + $0x28] sm:$0xff] %vm208_vm1, %v575_v48  ;;  %v577_v50 = vld [vmem:[%s569_s3 + $0x50] sm:$0xff] }
 0x2c7   : > { %584 = vst.msk [vmem:[%s1440_s24 + $0x30] sm:$0xff] %vm208_vm1, %v576_v49  ;;  %585 = vst.msk [vmem:[%s1440_s24 + $0x38] sm:$0xff] %vm208_vm1, %v577_v50 }
 0x2c8 PF: > { %p1053_p12 = scmp.ne.s32.totalorder %s1402_s7, 5 }
 0x2c9   : > { %s590_s5 = scalar_lea.vmem (!%p1053_p12), [#allocation2], %s1404_s12  ;;  %s1262_s9 = smov (!%p1053_p12), 127  }
 0x2ca   : > { %589 = sbr.rel (%p1053_p12) target bundleno = 849 (0x351), region = 52 }
 0x2cf   : > { %v593_v51 = vld [vmem:[%s590_s5 + $0x18] sm:$0xff]  ;;  %v591_v52 = vld [vmem:[%s590_s5] sm:$0xff]  ;;  %v592_v54 = vld [vmem:[%s590_s5 + $0x8] sm:$0xff]  ;;  %vm631_vm10 = vcmask 121856   ;;  %vm640_vm11 = vcmask 130168  }
 0x2d0   : > { %611 = vrot.lane.b32.xlu1 %v593_v51, %s1262_s9  ;;  %607 = vrot.lane.b32.xlu0 %v591_v52, %s1262_s9  ;;  %v594_v53 = vld [vmem:[%s590_s5 + $0x20] sm:$0xff]  ;;  %v596_v55 = vld [vmem:[%s590_s5 + $0x38] sm:$0xff] }
 0x2d1   : > { %v595_v56 = vld [vmem:[%s590_s5 + $0x30] sm:$0xff]  ;;  %v597_v58 = vld [vmem:[%s590_s5 + $0x48] sm:$0xff] }
 0x2d2   : > { %v598_v57 = vld [vmem:[%s590_s5 + $0x50] sm:$0xff] }
 0x2d4   : > { %613 = vrot.lane.b32.xlu1 %v594_v53, %s1262_s9  ;;  %609 = vrot.lane.b32.xlu0 %v592_v54, %s1262_s9 }
 0x2d8   : > { %617 = vrot.lane.b32.xlu1 %v596_v55, %s1262_s9  ;;  %615 = vrot.lane.b32.xlu0 %v595_v56, %s1262_s9 }
 0x2dc   : > { %621 = vrot.lane.b32.xlu1 %v598_v57, %s1262_s9  ;;  %619 = vrot.lane.b32.xlu0 %v597_v58, %s1262_s9 }
 0x342   : > { %v612_v59 = vpop.permute.xlu1 %611  ;;  %v608_v60 = vpop.permute.xlu0 %607 }
 0x343   : > { %634 = vst.msk [vmem:[%s1440_s24 + $0x10] sm:$0xff] %vm631_vm10, %v612_v59  ;;  %632 = vst.msk [vmem:[%s1440_s24] sm:$0xff] %vm631_vm10, %v608_v60 }
 0x344   : > { %643 = vst.msk [vmem:[%s1440_s24 + $0x10] sm:$0xff] %vm640_vm11, %v593_v51  ;;  %641 = vst.msk [vmem:[%s1440_s24] sm:$0xff] %vm640_vm11, %v591_v52 }
 0x346   : > { %v614_v61 = vpop.permute.xlu1 %613  ;;  %v610_v62 = vpop.permute.xlu0 %609 }
 0x347   : > { %635 = vst.msk [vmem:[%s1440_s24 + $0x18] sm:$0xff] %vm631_vm10, %v614_v61  ;;  %633 = vst.msk [vmem:[%s1440_s24 + $0x8] sm:$0xff] %vm631_vm10, %v610_v62 }
 0x348   : > { %644 = vst.msk [vmem:[%s1440_s24 + $0x18] sm:$0xff] %vm640_vm11, %v594_v53  ;;  %642 = vst.msk [vmem:[%s1440_s24 + $0x8] sm:$0xff] %vm640_vm11, %v592_v54 }
 0x34a   : > { %v618_v63 = vpop.permute.xlu1 %617  ;;  %v616_v0 = vpop.permute.xlu0 %615 }
 0x34b   : > { %637 = vst.msk [vmem:[%s1440_s24 + $0x28] sm:$0xff] %vm631_vm10, %v618_v63  ;;  %636 = vst.msk [vmem:[%s1440_s24 + $0x20] sm:$0xff] %vm631_vm10, %v616_v0 }
 0x34c   : > { %646 = vst.msk [vmem:[%s1440_s24 + $0x28] sm:$0xff] %vm640_vm11, %v596_v55  ;;  %645 = vst.msk [vmem:[%s1440_s24 + $0x20] sm:$0xff] %vm640_vm11, %v595_v56 }
 0x34e   : > { %v622_v1 = vpop.permute.xlu1 %621  ;;  %v620_v2 = vpop.permute.xlu0 %619 }
 0x34f   : > { %639 = vst.msk [vmem:[%s1440_s24 + $0x38] sm:$0xff] %vm631_vm10, %v622_v1  ;;  %638 = vst.msk [vmem:[%s1440_s24 + $0x30] sm:$0xff] %vm631_vm10, %v620_v2 }
 0x350   : > { %648 = vst.msk [vmem:[%s1440_s24 + $0x38] sm:$0xff] %vm640_vm11, %v598_v57  ;;  %647 = vst.msk [vmem:[%s1440_s24 + $0x30] sm:$0xff] %vm640_vm11, %v597_v58 }
 0x351 PF: > { %p1054_p13 = scmp.ne.s32.totalorder %s1402_s7, 6 }
 0x352   : > { %s653_s4 = scalar_lea.vmem (!%p1054_p13), [#allocation2], %s1404_s12  ;;  %s1264_s6 = smov (!%p1054_p13), 126  }
 0x353   : > { %652 = sbr.rel (%p1054_p13) target bundleno = 1012 (0x3f4), region = 56 }
 0x358   : > { %v1263_v3 = vmov 15   ;;  %v656_v4 = vld [vmem:[%s653_s4 + $0x18] sm:$0xff]  ;;  %v654_v5 = vld [vmem:[%s653_s4] sm:$0xff]  ;;  %v655_v7 = vld [vmem:[%s653_s4 + $0x8] sm:$0xff]  ;;  %vm694_vm12 = vcmask 113664   ;;  %vm735_vm13 = vcmask 130160  }
 0x359   : > { %1138 = vset.pattern.permute.xlu1 %v1263_v3  ;;  %1137 = vset.pattern.permute.xlu0 %v1263_v3  ;;  %v657_v6 = vld [vmem:[%s653_s4 + $0x20] sm:$0xff]  ;;  %v659_v8 = vld [vmem:[%s653_s4 + $0x38] sm:$0xff]  ;;  %v658_v9 = vld [vmem:[%s653_s4 + $0x30] sm:$0xff] }
 0x35a   : > { %712 = vperm.xlu1 %1138, %v656_v4   ;;  %704 = vperm.xlu0 %1137, %v654_v5   ;;  %v661_v10 = vld [vmem:[%s653_s4 + $0x50] sm:$0xff]  ;;  %v660_v11 = vld [vmem:[%s653_s4 + $0x48] sm:$0xff] }
 0x35e   : > { %716 = vperm.xlu1 %1138, %v657_v6   ;;  %708 = vperm.xlu0 %1137, %v655_v7  }
 0x362   : > { %724 = vperm.xlu1 %1138, %v659_v8   ;;  %720 = vperm.xlu0 %1137, %v658_v9  }
 0x366   : > { %732 = vperm.xlu1 %1138, %v661_v10   ;;  %728 = vperm.xlu0 %1137, %v660_v11  }
 0x36a   : > { %672 = vrot.lane.b32.xlu1 %v655_v7, %s1264_s6  ;;  %670 = vrot.lane.b32.xlu0 %v654_v5, %s1264_s6 }
 0x36e   : > { %676 = vrot.lane.b32.xlu1 %v657_v6, %s1264_s6  ;;  %674 = vrot.lane.b32.xlu0 %v656_v4, %s1264_s6 }
 0x372   : > { %680 = vrot.lane.b32.xlu1 %v659_v8, %s1264_s6  ;;  %678 = vrot.lane.b32.xlu0 %v658_v9, %s1264_s6 }
 0x376   : > { %684 = vrot.lane.b32.xlu1 %v661_v10, %s1264_s6  ;;  %682 = vrot.lane.b32.xlu0 %v660_v11, %s1264_s6 }
 0x3d5   : > { %v713_v12 = vpop.permute.xlu1 %712  ;;  %v705_v13 = vpop.permute.xlu0 %704 }
 0x3d9   : > { %v717_v14 = vpop.permute.xlu1 %716  ;;  %v709_v15 = vpop.permute.xlu0 %708 }
 0x3dd   : > { %v725_v16 = vpop.permute.xlu1 %724  ;;  %v721_v17 = vpop.permute.xlu0 %720 }
 0x3e1   : > { %v733_v18 = vpop.permute.xlu1 %732  ;;  %v729_v19 = vpop.permute.xlu0 %728 }
 0x3e5   : > { %v673_v20 = vpop.permute.xlu1 %672  ;;  %v671_v21 = vpop.permute.xlu0 %670 }
 0x3e6   : > { %696 = vst.msk [vmem:[%s1440_s24 + $0x8] sm:$0xff] %vm694_vm12, %v673_v20  ;;  %695 = vst.msk [vmem:[%s1440_s24] sm:$0xff] %vm694_vm12, %v671_v21 }
 0x3e7   : > { %737 = vst.msk [vmem:[%s1440_s24 + $0x8] sm:$0xff] %vm735_vm13, %v709_v15  ;;  %736 = vst.msk [vmem:[%s1440_s24] sm:$0xff] %vm735_vm13, %v705_v13 }
 0x3e9   : > { %v677_v22 = vpop.permute.xlu1 %676  ;;  %v675_v23 = vpop.permute.xlu0 %674 }
 0x3ea   : > { %698 = vst.msk [vmem:[%s1440_s24 + $0x18] sm:$0xff] %vm694_vm12, %v677_v22  ;;  %697 = vst.msk [vmem:[%s1440_s24 + $0x10] sm:$0xff] %vm694_vm12, %v675_v23 }
 0x3eb   : > { %739 = vst.msk [vmem:[%s1440_s24 + $0x18] sm:$0xff] %vm735_vm13, %v717_v14  ;;  %738 = vst.msk [vmem:[%s1440_s24 + $0x10] sm:$0xff] %vm735_vm13, %v713_v12 }
 0x3ed   : > { %v681_v24 = vpop.permute.xlu1 %680  ;;  %v679_v25 = vpop.permute.xlu0 %678 }
 0x3ee   : > { %700 = vst.msk [vmem:[%s1440_s24 + $0x28] sm:$0xff] %vm694_vm12, %v681_v24  ;;  %699 = vst.msk [vmem:[%s1440_s24 + $0x20] sm:$0xff] %vm694_vm12, %v679_v25 }
 0x3ef   : > { %741 = vst.msk [vmem:[%s1440_s24 + $0x28] sm:$0xff] %vm735_vm13, %v725_v16  ;;  %740 = vst.msk [vmem:[%s1440_s24 + $0x20] sm:$0xff] %vm735_vm13, %v721_v17 }
 0x3f1   : > { %v685_v26 = vpop.permute.xlu1 %684  ;;  %v683_v27 = vpop.permute.xlu0 %682 }
 0x3f2   : > { %702 = vst.msk [vmem:[%s1440_s24 + $0x38] sm:$0xff] %vm694_vm12, %v685_v26  ;;  %701 = vst.msk [vmem:[%s1440_s24 + $0x30] sm:$0xff] %vm694_vm12, %v683_v27 }
 0x3f3   : > { %743 = vst.msk [vmem:[%s1440_s24 + $0x38] sm:$0xff] %vm735_vm13, %v733_v18  ;;  %742 = vst.msk [vmem:[%s1440_s24 + $0x30] sm:$0xff] %vm735_vm13, %v729_v19 }
 0x3f4 PF: > { %p1055_p1 = scmp.ne.s32.totalorder %s1402_s7, 7 }
 0x3f5   : > { %s748_s8 = scalar_lea.vmem (!%p1055_p1), [#allocation2], %s1404_s12  ;;  %s1266_s10 = smov (!%p1055_p1), 125  }
 0x3f6   : > { %747 = sbr.rel (%p1055_p1) target bundleno = 1175 (0x497), region = 60 }
 0x3fb   : > { %v1265_v28 = vmov 15   ;;  %v751_v29 = vld [vmem:[%s748_s8 + $0x18] sm:$0xff]  ;;  %v749_v30 = vld [vmem:[%s748_s8] sm:$0xff]  ;;  %v750_v32 = vld [vmem:[%s748_s8 + $0x8] sm:$0xff]  ;;  %vm789_vm14 = vcmask 105472   ;;  %vm830_vm15 = vcmask 130152  }
 0x3fc   : > { %1140 = vset.pattern.permute.xlu1 %v1265_v28  ;;  %1139 = vset.pattern.permute.xlu0 %v1265_v28  ;;  %v752_v31 = vld [vmem:[%s748_s8 + $0x20] sm:$0xff]  ;;  %v754_v33 = vld [vmem:[%s748_s8 + $0x38] sm:$0xff]  ;;  %v753_v34 = vld [vmem:[%s748_s8 + $0x30] sm:$0xff] }
 0x3fd   : > { %807 = vperm.xlu1 %1140, %v751_v29   ;;  %799 = vperm.xlu0 %1139, %v749_v30   ;;  %v756_v35 = vld [vmem:[%s748_s8 + $0x50] sm:$0xff]  ;;  %v755_v36 = vld [vmem:[%s748_s8 + $0x48] sm:$0xff] }
 0x401   : > { %811 = vperm.xlu1 %1140, %v752_v31   ;;  %803 = vperm.xlu0 %1139, %v750_v32  }
 0x405   : > { %819 = vperm.xlu1 %1140, %v754_v33   ;;  %815 = vperm.xlu0 %1139, %v753_v34  }
 0x409   : > { %827 = vperm.xlu1 %1140, %v756_v35   ;;  %823 = vperm.xlu0 %1139, %v755_v36  }
 0x40d   : > { %767 = vrot.lane.b32.xlu1 %v750_v32, %s1266_s10  ;;  %765 = vrot.lane.b32.xlu0 %v749_v30, %s1266_s10 }
 0x411   : > { %771 = vrot.lane.b32.xlu1 %v752_v31, %s1266_s10  ;;  %769 = vrot.lane.b32.xlu0 %v751_v29, %s1266_s10 }
 0x415   : > { %775 = vrot.lane.b32.xlu1 %v754_v33, %s1266_s10  ;;  %773 = vrot.lane.b32.xlu0 %v753_v34, %s1266_s10 }
 0x419   : > { %779 = vrot.lane.b32.xlu1 %v756_v35, %s1266_s10  ;;  %777 = vrot.lane.b32.xlu0 %v755_v36, %s1266_s10 }
 0x478   : > { %v808_v37 = vpop.permute.xlu1 %807  ;;  %v800_v38 = vpop.permute.xlu0 %799 }
 0x47c   : > { %v812_v39 = vpop.permute.xlu1 %811  ;;  %v804_v40 = vpop.permute.xlu0 %803 }
 0x480   : > { %v820_v41 = vpop.permute.xlu1 %819  ;;  %v816_v42 = vpop.permute.xlu0 %815 }
 0x484   : > { %v828_v43 = vpop.permute.xlu1 %827  ;;  %v824_v44 = vpop.permute.xlu0 %823 }
 0x488   : > { %v768_v45 = vpop.permute.xlu1 %767  ;;  %v766_v46 = vpop.permute.xlu0 %765 }
 0x489   : > { %791 = vst.msk [vmem:[%s1440_s24 + $0x8] sm:$0xff] %vm789_vm14, %v768_v45  ;;  %790 = vst.msk [vmem:[%s1440_s24] sm:$0xff] %vm789_vm14, %v766_v46 }
 0x48a   : > { %832 = vst.msk [vmem:[%s1440_s24 + $0x8] sm:$0xff] %vm830_vm15, %v804_v40  ;;  %831 = vst.msk [vmem:[%s1440_s24] sm:$0xff] %vm830_vm15, %v800_v38 }
 0x48c   : > { %v772_v47 = vpop.permute.xlu1 %771  ;;  %v770_v48 = vpop.permute.xlu0 %769 }
 0x48d   : > { %793 = vst.msk [vmem:[%s1440_s24 + $0x18] sm:$0xff] %vm789_vm14, %v772_v47  ;;  %792 = vst.msk [vmem:[%s1440_s24 + $0x10] sm:$0xff] %vm789_vm14, %v770_v48 }
 0x48e   : > { %834 = vst.msk [vmem:[%s1440_s24 + $0x18] sm:$0xff] %vm830_vm15, %v812_v39  ;;  %833 = vst.msk [vmem:[%s1440_s24 + $0x10] sm:$0xff] %vm830_vm15, %v808_v37 }
 0x490   : > { %v776_v49 = vpop.permute.xlu1 %775  ;;  %v774_v50 = vpop.permute.xlu0 %773 }
 0x491   : > { %795 = vst.msk [vmem:[%s1440_s24 + $0x28] sm:$0xff] %vm789_vm14, %v776_v49  ;;  %794 = vst.msk [vmem:[%s1440_s24 + $0x20] sm:$0xff] %vm789_vm14, %v774_v50 }
 0x492   : > { %836 = vst.msk [vmem:[%s1440_s24 + $0x28] sm:$0xff] %vm830_vm15, %v820_v41  ;;  %835 = vst.msk [vmem:[%s1440_s24 + $0x20] sm:$0xff] %vm830_vm15, %v816_v42 }
 0x494   : > { %v780_v51 = vpop.permute.xlu1 %779  ;;  %v778_v52 = vpop.permute.xlu0 %777 }
 0x495   : > { %797 = vst.msk [vmem:[%s1440_s24 + $0x38] sm:$0xff] %vm789_vm14, %v780_v51  ;;  %796 = vst.msk [vmem:[%s1440_s24 + $0x30] sm:$0xff] %vm789_vm14, %v778_v52 }
 0x496   : > { %838 = vst.msk [vmem:[%s1440_s24 + $0x38] sm:$0xff] %vm830_vm15, %v828_v43  ;;  %837 = vst.msk [vmem:[%s1440_s24 + $0x30] sm:$0xff] %vm830_vm15, %v824_v44 }
 0x497 PF: > { %p1056_p5 = scmp.ne.s32.totalorder %s1402_s7, 8 }
 0x498   : > { %s843_s11 = scalar_lea.vmem (!%p1056_p5), [#allocation2], %s1404_s12  ;;  %s1268_s7 = smov (!%p1056_p5), 124  }
 0x499   : > { %842 = sbr.rel (%p1056_p5) target bundleno = 1338 (0x53a), region = 64 }
 0x49e   : > { %v1267_v53 = vmov 15   ;;  %v846_v54 = vld [vmem:[%s843_s11 + $0x18] sm:$0xff]  ;;  %v844_v55 = vld [vmem:[%s843_s11] sm:$0xff]  ;;  %v845_v57 = vld [vmem:[%s843_s11 + $0x8] sm:$0xff]  ;;  %vm884_vm0 = vcmask 97280   ;;  %vm925_vm1 = vcmask 130144  }
 0x49f   : > { %1142 = vset.pattern.permute.xlu1 %v1267_v53  ;;  %1141 = vset.pattern.permute.xlu0 %v1267_v53  ;;  %v847_v56 = vld [vmem:[%s843_s11 + $0x20] sm:$0xff]  ;;  %v849_v58 = vld [vmem:[%s843_s11 + $0x38] sm:$0xff]  ;;  %v848_v59 = vld [vmem:[%s843_s11 + $0x30] sm:$0xff] }
 0x4a0   : > { %902 = vperm.xlu1 %1142, %v846_v54   ;;  %894 = vperm.xlu0 %1141, %v844_v55   ;;  %v851_v60 = vld [vmem:[%s843_s11 + $0x50] sm:$0xff]  ;;  %v850_v61 = vld [vmem:[%s843_s11 + $0x48] sm:$0xff] }
 0x4a4   : > { %906 = vperm.xlu1 %1142, %v847_v56   ;;  %898 = vperm.xlu0 %1141, %v845_v57  }
 0x4a8   : > { %914 = vperm.xlu1 %1142, %v849_v58   ;;  %910 = vperm.xlu0 %1141, %v848_v59  }
 0x4ac   : > { %922 = vperm.xlu1 %1142, %v851_v60   ;;  %918 = vperm.xlu0 %1141, %v850_v61  }
 0x4b0   : > { %862 = vrot.lane.b32.xlu1 %v845_v57, %s1268_s7  ;;  %860 = vrot.lane.b32.xlu0 %v844_v55, %s1268_s7 }
 0x4b4   : > { %866 = vrot.lane.b32.xlu1 %v847_v56, %s1268_s7  ;;  %864 = vrot.lane.b32.xlu0 %v846_v54, %s1268_s7 }
 0x4b8   : > { %870 = vrot.lane.b32.xlu1 %v849_v58, %s1268_s7  ;;  %868 = vrot.lane.b32.xlu0 %v848_v59, %s1268_s7 }
 0x4bc   : > { %874 = vrot.lane.b32.xlu1 %v851_v60, %s1268_s7  ;;  %872 = vrot.lane.b32.xlu0 %v850_v61, %s1268_s7 }
 0x51b   : > { %v903_v62 = vpop.permute.xlu1 %902  ;;  %v895_v63 = vpop.permute.xlu0 %894 }
 0x51f   : > { %v907_v0 = vpop.permute.xlu1 %906  ;;  %v899_v1 = vpop.permute.xlu0 %898 }
 0x523   : > { %v915_v2 = vpop.permute.xlu1 %914  ;;  %v911_v3 = vpop.permute.xlu0 %910 }
 0x527   : > { %v923_v4 = vpop.permute.xlu1 %922  ;;  %v919_v5 = vpop.permute.xlu0 %918 }
 0x52b   : > { %v863_v6 = vpop.permute.xlu1 %862  ;;  %v861_v7 = vpop.permute.xlu0 %860 }
 0x52c   : > { %886 = vst.msk [vmem:[%s1440_s24 + $0x8] sm:$0xff] %vm884_vm0, %v863_v6  ;;  %885 = vst.msk [vmem:[%s1440_s24] sm:$0xff] %vm884_vm0, %v861_v7 }
 0x52d   : > { %927 = vst.msk [vmem:[%s1440_s24 + $0x8] sm:$0xff] %vm925_vm1, %v899_v1  ;;  %926 = vst.msk [vmem:[%s1440_s24] sm:$0xff] %vm925_vm1, %v895_v63 }
 0x52f   : > { %v867_v8 = vpop.permute.xlu1 %866  ;;  %v865_v9 = vpop.permute.xlu0 %864 }
 0x530   : > { %888 = vst.msk [vmem:[%s1440_s24 + $0x18] sm:$0xff] %vm884_vm0, %v867_v8  ;;  %887 = vst.msk [vmem:[%s1440_s24 + $0x10] sm:$0xff] %vm884_vm0, %v865_v9 }
 0x531   : > { %929 = vst.msk [vmem:[%s1440_s24 + $0x18] sm:$0xff] %vm925_vm1, %v907_v0  ;;  %928 = vst.msk [vmem:[%s1440_s24 + $0x10] sm:$0xff] %vm925_vm1, %v903_v62 }
 0x533   : > { %v871_v10 = vpop.permute.xlu1 %870  ;;  %v869_v11 = vpop.permute.xlu0 %868 }
 0x534   : > { %890 = vst.msk [vmem:[%s1440_s24 + $0x28] sm:$0xff] %vm884_vm0, %v871_v10  ;;  %889 = vst.msk [vmem:[%s1440_s24 + $0x20] sm:$0xff] %vm884_vm0, %v869_v11 }
 0x535   : > { %931 = vst.msk [vmem:[%s1440_s24 + $0x28] sm:$0xff] %vm925_vm1, %v915_v2  ;;  %930 = vst.msk [vmem:[%s1440_s24 + $0x20] sm:$0xff] %vm925_vm1, %v911_v3 }
 0x537   : > { %v875_v12 = vpop.permute.xlu1 %874  ;;  %v873_v13 = vpop.permute.xlu0 %872 }
 0x538   : > { %892 = vst.msk [vmem:[%s1440_s24 + $0x38] sm:$0xff] %vm884_vm0, %v875_v12  ;;  %891 = vst.msk [vmem:[%s1440_s24 + $0x30] sm:$0xff] %vm884_vm0, %v873_v13 }
 0x539   : > { %933 = vst.msk [vmem:[%s1440_s24 + $0x38] sm:$0xff] %vm925_vm1, %v923_v4  ;;  %932 = vst.msk [vmem:[%s1440_s24 + $0x30] sm:$0xff] %vm925_vm1, %v919_v5 }
 0x53a PF: > { %s1065_s12 = sshll.u32 %s1311_s17, 10  ;;  %s948_s21 = sshll.u32 %s1440_s24, 4  ;;  %s1739_s21 = int_to_ptr.vmem [resolvable:$true] %s948_s21 }
 0x53b   : > { %s1736_s20 = scalar_lea.hbm %s1784_s2, %s1065_s12  ;;  %s935_s23 = scalar_lea.sflag [#allocation7], %s1387_s30 }
 0x53c   : > { %s1183_s27 = scalar_lea.vmem %s1739_s21, 1024  ;;  %p1793_p0 = scmp.ne.s32.totalorder %s1789_s25, 0 }
 0x53d   : > { %p1184_p7 = scmp.ne.s32.totalorder %s1739_s21, %s1183_s27  ;;  %s1269_s28 = smov [#allocation8]  }
 0x53e   : > { %s1187_s29 = sshll.u32 %s1269_s28, 4  ;;  %s1188_s29 = int_to_ptr.vmem [resolvable:$false] %s1187_s29 }
 0x53f   : > { %p1185_p6 = pnand %p1184_p7, %p1793_p0  ;;  %s1189_s17 = scalar_lea.vmem %s1188_s29, 2048 }
 0x540   : > { %p1190_p11 = scmp.lt.s32.totalorder %s1739_s21, %s1188_s29  ;;  %p1191_p2 = scmp.lt.s32.totalorder %s1189_s17, %s1183_s27 }
 0x541   : > { %p1186_p8 = pneg %p1185_p6 }
 0x542   : > { %p1192_p3 = por %p1191_p2, %p1190_p11 }
 0x544   : > { %p1193_p4 = pnand %p1192_p3, %p1186_p8 }
 0x546   : > { %1196 = shalt.err (!%p1193_p4)
}
 0x547   : > { %s1197_s24 = scalar_lea.hbm %s1736_s20, 1024  ;;  %s1201_s9 = scalar_lea.hbm %s1784_s2, 2048 }
 0x548   : > { %p1198_p9 = scmp.ne.s32.totalorder %s1736_s20, %s1197_s24  ;;  %p1202_p13 = scmp.lt.s32.totalorder %s1736_s20, %s1784_s2 }
 0x549   : > { %p1203_p1 = scmp.lt.s32.totalorder %s1201_s9, %s1197_s24 }
 0x54a   : > { %p1199_p10 = pnand %p1198_p9, %p1793_p0 }
 0x54b   : > { %p1204_p5 = por %p1203_p1, %p1202_p13 }
 0x54c   : > { %p1200_p12 = pneg %p1199_p10 }
 0x54e   : > { %p1205_p7 = pnand %p1204_p5, %p1200_p12 }
 0x550   : > { %1208 = shalt.err (!%p1205_p7)
}
 0x551   : > { %s1270_s8 = smov 128   ;;  %s1271_s10 = smov 8  }
 0x552   : > { %1068 = dma.vmem_to_hbm [thread:$0]  (%p1793_p0), %s1739_s21, 1024, %s1736_s20, %s935_s23, %s1270_s8, %s1270_s8, %s1271_s10  }
 0x553 PF: > { %s963_s11 = sand.u32 1, %s1237_s14   ;;  %p1794_p6 = scmp.ne.s32.totalorder %s1790_s26, 0 }
 0x554   : > { %p1795_p8 = scmp.ge.s32.totalorder %s1249_s16, 2  ;;  %s964_s7 = scalar_lea.sflag [#allocation7], %s963_s11 }
 0x556   : > { %p1075_p11 = pnand %p1795_p8, %p1794_p6 }
 0x558   : > { %p1076_p2 = pneg %p1075_p11 }
 0x55a   : > { %1232 = dma.done.wait (%p1076_p2), %s964_s7, 1024  }
 0x55b   : > { %1234 = vsyncadd (%p1076_p2), %s964_s7, 4294966272  ;;  %p21_p3 = scmp.ge.s32.totalorder %s1315_s19, 4   ;;  %s1796_s14 = smov %s1241_s0 }
 0x55c   : > { %s1797_s0 = smov %s1245_s15  ;;  %s1798_s15 = smov %s1327_s22 }
 0x55d   : > { %s1799_s16 = smov %s1315_s19  ;;  %23 = sbr.rel (!%p21_p3) target bundleno = 20 (0x14), region = 114 }
 0x562   :  { %969 = vsyncpa [#allocation6], 1 }
 0x563   :  { %971 = vsyncpa [#allocation6 + $0x1], 1 }
 0x564   :  { %972 = vsyncpa [#allocation7], 1 }
 0x565   :  { %974 = vsyncpa [#allocation7 + $0x1], 1 }

</bundles_post_ra>
